<compile_context>
chip_gen: v7x
topology: tpu7x:2x2x1
jax: 0.10.0
libtpu: 0.0.40
codegen_flags: <defaults>
</compile_context>

<pallas_src>
import math
import jax
import jax.numpy as jnp
from jax.experimental import pallas as pl
from jax.experimental.pallas import tpu as pltpu

HIDDEN = 128
NUM_HEADS = 8
HEAD_DIM = HIDDEN // NUM_HEADS
D_MAX = 128          # padded per-modality input dim (>= every input_dims value)
LN_EPS = 1e-5        # matches torch.nn.LayerNorm default


def _layer_norm(x, gamma, beta):
    mu = jnp.mean(x, axis=-1, keepdims=True)
    var = jnp.mean((x - mu) ** 2, axis=-1, keepdims=True)
    return (x - mu) * jax.lax.rsqrt(var + LN_EPS) * gamma + beta


# --------------------------------------------------------------------------
# Pallas kernel: whole forward pass (projections -> MHA -> LN/FF/LN -> mean
# -> final projection) fused and VMEM-resident, tiled over the batch.
# --------------------------------------------------------------------------
def attention_fusion_kernel(
    x_ref,          # (M, TB, D_MAX) bf16 padded modality inputs
    wproj_ref,      # (M, D_MAX, H)  bf16
    wqkv_ref,       # (H, 3H)        bf16 (softmax 1/sqrt(hd) folded into Q cols)
    wo_ref,         # (H, H)         bf16
    w1_ref,         # (H, 4H)        bf16
    b1_ref,         # (1, 4H)        f32
    w2_ref,         # (4H, H)        bf16
    wf_ref,         # (H, H)         bf16
    bd_ref,         # (H, H)         bf16 block-diagonal head mask (0/1)
    const_ref,      # (M+10, H)      f32 packed biases / LayerNorm params
    raw_out_ref,    # (TB, M*H)      f32 -> raw_features (host reshape to (B,M,H))
    fused_out_ref,  # (TB, H)        f32 -> features
):
    M, TB, _ = x_ref.shape
    H = wo_ref.shape[0]
    R = M * TB

    # ---- unpack the constant slab (all f32, element-wise path stays f32) ----
    c = const_ref[...]
    b_proj = c[0:M, :][:, None, :]                       # (M, 1, H)
    b_q = c[M + 0:M + 1, :]                              # scale already folded in
    b_k = c[M + 1:M + 2, :]
    b_v = c[M + 2:M + 3, :]
    b_o = c[M + 3:M + 4, :]
    g1, be1 = c[M + 4:M + 5, :], c[M + 5:M + 6, :]
    g2, be2 = c[M + 6:M + 7, :], c[M + 7:M + 8, :]
    b_ff2 = c[M + 8:M + 9, :]
    b_fin = c[M + 9:M + 10, :]

    # ---- all modality projections in one batched bf16 matmul (f32 accumulate) ----
    stacked = jnp.einsum('mbd,mdh->mbh', x_ref[...], wproj_ref[...],
                         preferred_element_type=jnp.float32) + b_proj    # (M,TB,H) f32

    # raw_features written lane-dense in batch-major order: each chunk is 128-lane
    # aligned so this concat is pure vreg placement; host reshape is metadata-only.
    raw_out_ref[...] = jnp.concatenate([stacked[m] for m in range(M)], axis=1)

    x2 = stacked.reshape(R, H)                                           # f32

    # ---- fused QKV projection: single (R, H) @ (H, 3H) bf16 push ----
    qkv = jnp.dot(x2.astype(jnp.bfloat16), wqkv_ref[...],
                  preferred_element_type=jnp.float32)                    # (R, 3H) f32
    q3 = (qkv[:, 0 * H:1 * H] + b_q).reshape(M, TB, H)
    k3 = (qkv[:, 1 * H:2 * H] + b_k).reshape(M, TB, H)
    v3 = (qkv[:, 2 * H:3 * H] + b_v).reshape(M, TB, H)

    # ---- multi-head attention via ONE block-diagonal matmul ----
    # t[m,n,b,d] = sum_{e: head(e)==head(d)} q[m,b,e]*k[n,b,e]  == per-head score
    # broadcast across the 16 lanes of its head.  Softmax over the key axis then
    # runs per-lane and its result is directly the per-lane attention weight, so
    # no second selector matmul is needed.
    prod = q3[:, None, :, :] * k3[None, :, :, :]                         # (M,M,TB,H)
    t = jnp.dot(prod.reshape(M * M * TB, H).astype(jnp.bfloat16), bd_ref[...],
                preferred_element_type=jnp.float32).reshape(M, M, TB, H)
    t_max = jnp.max(t, axis=1, keepdims=True)
    p = jnp.exp(t - t_max)
    denom = jnp.sum(p, axis=1, keepdims=True)
    p = p * pl.reciprocal(denom, approx=True)                            # softmax
    o = jnp.sum(p * v3[None, :, :, :], axis=1)                           # (M, TB, H)
    attn = jnp.dot(o.reshape(R, H).astype(jnp.bfloat16), wo_ref[...],
                   preferred_element_type=jnp.float32) + b_o

    # ---- residual + LayerNorm1 ----
    a1 = _layer_norm(attn + x2, g1, be1)

    # ---- feedforward (dropout == identity at inference) ----
    ffh = jnp.maximum(
        jnp.dot(a1.astype(jnp.bfloat16), w1_ref[...],
                preferred_element_type=jnp.float32) + b1_ref[...], 0.0)
    ff = jnp.dot(ffh.astype(jnp.bfloat16), w2_ref[...],
                 preferred_element_type=jnp.float32) + b_ff2

    # ---- residual + LayerNorm2 ----
    a2 = _layer_norm(a1 + ff, g2, be2)

    # ---- mean over modality axis + final projection (Linear + ReLU) ----
    fused = jnp.mean(a2.reshape(M, TB, H), axis=0)                       # (TB, H)
    fused = jnp.maximum(
        jnp.dot(fused.astype(jnp.bfloat16), wf_ref[...],
                preferred_element_type=jnp.float32) + b_fin, 0.0)
    fused_out_ref[...] = fused


# --------------------------------------------------------------------------
# Wrapper / glue
# --------------------------------------------------------------------------
def _const_spec(shape):
    nd = len(shape)
    return pl.BlockSpec(shape, lambda b, _nd=nd: (0,) * _nd)


def _pick_batch_tile(B):
    # Tiny batches: one full-array block.  Otherwise sublane-aligned tiles capped
    # at 256 (v7x 64 MiB VMEM headroom) and sized so the grid has >= 2 steps
    # (megacore on v7x, DMA/compute overlap on v5e/v6e).  The batch gets
    # zero-padded up to a tile multiple host-side, so any B is safe.
    if B <= 8:
        return B
    return min(256, max(8, (B // 2) // 8 * 8))


def _vmem_limit_bytes():
    # 64 MiB on 128 MiB chips (v5e/v6e), 32 MiB on v7x; safe fallback 32 MiB.
    try:
        cap = pltpu.get_tpu_info().vmem_capacity_bytes
        return int(min(64 * 1024 * 1024, max(32 * 1024 * 1024, cap // 2)))
    except Exception:
        return 32 * 1024 * 1024


def attention_fusion_forward(params, features):
    modalities = sorted(features.keys())
    B = next(iter(features.values())).shape[0]
    M = len(modalities)
    H = HIDDEN

    # --- host-side layout plumbing (stays outside the kernel) ---
    cols = []
    for name in modalities:
        f = features[name].astype(jnp.float32)
        d = f.shape[1]
        assert d <= D_MAX, f"input dim {d} for '{name}' exceeds D_MAX={D_MAX}"
        cols.append(jnp.pad(f, ((0, 0), (0, D_MAX - d))) if d < D_MAX else f)
    x_mbd = jnp.stack(cols, axis=0).astype(jnp.bfloat16)        # (M, B, D_MAX) bf16

    TB = _pick_batch_tile(B)
    B_pad = ((B + TB - 1) // TB) * TB
    if B_pad != B:
        x_mbd = jnp.pad(x_mbd, ((0, 0), (0, B_pad - B), (0, 0)))
    grid = (B_pad // TB,)

    # fuse Q/K/V into one (H, 3H) bf16 weight; fold softmax scale into the Q part
    scale = 1.0 / math.sqrt(HEAD_DIM)
    w_qkv, b_qkv = params['w_qkv'], params['b_qkv']
    w_qkv_f = jnp.concatenate([w_qkv[0] * scale, w_qkv[1], w_qkv[2]],
                              axis=1).astype(jnp.bfloat16)      # (H, 3H)

    # packed constant slab: b_proj | bq bk bv | b_o | ln1 | ln2 | b_ff2 | b_final
    const = jnp.concatenate([
        params['b_proj'],                                       # (M, H)
        (b_qkv[0] * scale)[None, :],
        b_qkv[1][None, :],
        b_qkv[2][None, :],
        params['b_o'],                                          # (1, H)
        params['ln1'],                                          # (2, H)
        params['ln2'],                                          # (2, H)
        params['b_ff2'],                                        # (1, H)
        params['b_final'],                                      # (1, H)
    ], axis=0).astype(jnp.float32)                              # (M+10, H)

    # block-diagonal head-segment mask: bd[d, e] = 1 iff head(d) == head(e)
    lane = jnp.arange(H)
    bd = (lane[:, None] // HEAD_DIM == lane[None, :] // HEAD_DIM).astype(jnp.bfloat16)

    args = [
        x_mbd,
        params['w_proj'].astype(jnp.bfloat16),
        w_qkv_f,
        params['w_o'].astype(jnp.bfloat16),
        params['w_ff1'].astype(jnp.bfloat16),
        params['b_ff1'].astype(jnp.float32),
        params['w_ff2'].astype(jnp.bfloat16),
        params['w_final'].astype(jnp.bfloat16),
        bd,
        const,
    ]

    in_specs = [pl.BlockSpec((M, TB, D_MAX), lambda b: (0, b, 0))]
    in_specs += [_const_spec(a.shape) for a in args[1:]]

    out_shapes = (
        jax.ShapeDtypeStruct((B_pad, M * H), jnp.float32),      # raw features (flat)
        jax.ShapeDtypeStruct((B_pad, H), jnp.float32),          # fused features
    )
    out_specs = (
        pl.BlockSpec((TB, M * H), lambda b: (b, 0)),
        pl.BlockSpec((TB, H), lambda b: (b, 0)),
    )

    # rough roofline hint for XLA's scheduler around the custom call
    R = B_pad * M
    flops = (2 * R * D_MAX * H + 2 * R * H * 3 * H + 2 * R * M * H * H
             + 4 * R * M * H + 2 * R * H * H + 16 * R * H * H + 2 * B_pad * H * H)
    bytes_accessed = (2 * sum(int(a.size) for a in args if a.dtype == jnp.bfloat16)
                      + 4 * sum(int(a.size) for a in args if a.dtype == jnp.float32)
                      + 4 * (B_pad * M * H + B_pad * H))
    cost = pl.CostEstimate(flops=flops,
                           transcendentals=R * M * H + R * H,
                           bytes_accessed=bytes_accessed)

    raw_flat, fused = pl.pallas_call(
        attention_fusion_kernel,
        grid=grid,
        in_specs=in_specs,
        out_specs=out_specs,
        out_shape=out_shapes,
        compiler_params=pltpu.CompilerParams(
            dimension_semantics=("parallel",),
            vmem_limit_bytes=_vmem_limit_bytes(),
        ),
        cost_estimate=cost,
    )(*args)

    # TODO(synk): classifier logits / attention_weights outputs omitted — the
    # forward() defaults (return_logits=False, return_attention_weights=False)
    # only produce 'features' and 'raw_features'.
    return {'features': fused[:B],
            'raw_features': raw_flat[:B].reshape(B, M, H)}      # metadata-only reshape


# --------------------------------------------------------------------------
# Deterministic parameter init (synthetic, shapes per module __init__)
# --------------------------------------------------------------------------
def init_params(key, input_dims, hidden=HIDDEN):
    modalities = sorted(input_dims.keys())
    M = len(modalities)
    H = hidden
    ks = jax.random.split(key, 20)
    scale = 0.02

    w_proj = jnp.zeros((M, D_MAX, H), jnp.float32)
    b_proj = jax.random.normal(ks[0], (M, H), jnp.float32) * scale
    for m, name in enumerate(modalities):
        d = input_dims[name]
        w = jax.random.normal(ks[1 + m], (d, H), jnp.float32) * scale
        w_proj = w_proj.at[m, :d, :].set(w)

    return {
        'd_max': D_MAX,
        'w_proj': w_proj, 'b_proj': b_proj,
        'w_qkv': jax.random.normal(ks[5], (3, H, H), jnp.float32) * scale,
        'b_qkv': jax.random.normal(ks[6], (3, H), jnp.float32) * scale,
        'w_o': jax.random.normal(ks[7], (H, H), jnp.float32) * scale,
        'b_o': jax.random.normal(ks[8], (1, H), jnp.float32) * scale,
        'ln1': jnp.stack([1.0 + 0.1 * jax.random.normal(ks[9], (H,), jnp.float32),
                          0.1 * jax.random.normal(ks[10], (H,), jnp.float32)]),
        'ln2': jnp.stack([1.0 + 0.1 * jax.random.normal(ks[11], (H,), jnp.float32),
                          0.1 * jax.random.normal(ks[12], (H,), jnp.float32)]),
        'w_ff1': jax.random.normal(ks[13], (H, 4 * H), jnp.float32) * scale,
        'b_ff1': jax.random.normal(ks[14], (1, 4 * H), jnp.float32) * scale,
        'w_ff2': jax.random.normal(ks[15], (4 * H, H), jnp.float32) * scale,
        'b_ff2': jax.random.normal(ks[16], (1, H), jnp.float32) * scale,
        'w_final': jax.random.normal(ks[17], (H, H), jnp.float32) * scale,
        'b_final': jax.random.normal(ks[18], (1, H), jnp.float32) * scale,
    }


# --------------------------------------------------------------------------
# Pure-JAX reference (mirrors the PyTorch forward in eval mode, all f32)
# --------------------------------------------------------------------------
def reference_forward(params, features):
    modalities = sorted(features.keys())
    projs = []
    for m, name in enumerate(modalities):
        d = features[name].shape[1]
        w = params['w_proj'][m, :d, :]
        projs.append((features[name] @ w + params['b_proj'][m])[:, None, :])
    stacked = jnp.concatenate(projs, axis=1)           # (B, M, H)
    B, M, H = stacked.shape
    x2 = stacked.reshape(B * M, H)

    q = (x2 @ params['w_qkv'][0] + params['b_qkv'][0]).reshape(B, M, NUM_HEADS, HEAD_DIM)
    k = (x2 @ params['w_qkv'][1] + params['b_qkv'][1]).reshape(B, M, NUM_HEADS, HEAD_DIM)
    v = (x2 @ params['w_qkv'][2] + params['b_qkv'][2]).reshape(B, M, NUM_HEADS, HEAD_DIM)
    s = jnp.einsum('bmhd,bnhd->bhmn', q, k) / math.sqrt(HEAD_DIM)
    p = jax.nn.softmax(s, axis=-1)
    o = jnp.einsum('bhmn,bnhd->bmhd', p, v).reshape(B * M, H)
    attn = o @ params['w_o'] + params['b_o']

    a1 = _layer_norm(attn + x2, params['ln1'][0], params['ln1'][1])
    ff = jnp.maximum(a1 @ params['w_ff1'] + params['b_ff1'], 0.0) @ params['w_ff2'] + params['b_ff2']
    a2 = _layer_norm(a1 + ff, params['ln2'][0], params['ln2'][1])
    fused = jnp.mean(a2.reshape(B, M, H), axis=1)
    fused = jnp.maximum(fused @ params['w_final'] + params['b_final'], 0.0)
    return {'features': fused, 'raw_features': stacked}


if __name__ == "__main__":
    key = jax.random.PRNGKey(0)
    input_dims = {"audio": 96, "text": 128, "vision": 64}
    B = 4

    kp, kf = jax.random.split(key)
    params = init_params(kp, input_dims)

    fkeys = jax.random.split(kf, len(input_dims))
    features = {
        name: jax.random.normal(fkeys[i], (B, dim), jnp.float32)
        for i, (name, dim) in enumerate(sorted(input_dims.items()))
    }

    out = attention_fusion_forward(params, features)
    jax.block_until_ready(out)

    ref = reference_forward(params, features)
    # bf16 matmul operands with f32 accumulation: slightly looser tolerance than f32.
    for name in ('features', 'raw_features'):
        assert out[name].shape == ref[name].shape, name
        assert jnp.allclose(out[name], ref[name], atol=2e-2, rtol=2e-2), name

    print("KERNEL_OK")
</pallas_src>

<mosaic_0001>
module attributes {stable_mosaic.version = 11 : i64} {
  func.func @attention_fusion_kernel(%arg0: i32, %arg1: memref<3x4x128xbf16, #tpu.memory_space<vmem>>, %arg2: memref<3x128x128xbf16, #tpu.memory_space<vmem>>, %arg3: memref<128x384xbf16, #tpu.memory_space<vmem>>, %arg4: memref<128x128xbf16, #tpu.memory_space<vmem>>, %arg5: memref<128x512xbf16, #tpu.memory_space<vmem>>, %arg6: memref<1x512xf32, #tpu.memory_space<vmem>>, %arg7: memref<512x128xbf16, #tpu.memory_space<vmem>>, %arg8: memref<128x128xbf16, #tpu.memory_space<vmem>>, %arg9: memref<128x128xbf16, #tpu.memory_space<vmem>>, %arg10: memref<13x128xf32, #tpu.memory_space<vmem>>, %arg11: memref<4x384xf32, #tpu.memory_space<vmem>>, %arg12: memref<4x128xf32, #tpu.memory_space<vmem>>) attributes {dimension_semantics = [#tpu.dimension_semantics<parallel>], iteration_bounds = array<i64: 1>, scalar_prefetch = 0 : i64, scratch_operands = 0 : i64, tpu.core_type = #tpu.core_type<tc>, window_params = [{transform_indices = @transform_0, window_bounds = array<i64: 3, 4, 128>}, {pipeline_mode = #tpu.pipeline_mode<synchronous>, transform_indices = @transform_1, window_bounds = array<i64: 3, 128, 128>}, {pipeline_mode = #tpu.pipeline_mode<synchronous>, transform_indices = @transform_2, window_bounds = array<i64: 128, 384>}, {pipeline_mode = #tpu.pipeline_mode<synchronous>, transform_indices = @transform_3, window_bounds = array<i64: 128, 128>}, {pipeline_mode = #tpu.pipeline_mode<synchronous>, transform_indices = @transform_4, window_bounds = array<i64: 128, 512>}, {pipeline_mode = #tpu.pipeline_mode<synchronous>, transform_indices = @transform_5, window_bounds = array<i64: 1, 512>}, {pipeline_mode = #tpu.pipeline_mode<synchronous>, transform_indices = @transform_6, window_bounds = array<i64: 512, 128>}, {pipeline_mode = #tpu.pipeline_mode<synchronous>, transform_indices = @transform_7, window_bounds = array<i64: 128, 128>}, {pipeline_mode = #tpu.pipeline_mode<synchronous>, transform_indices = @transform_8, window_bounds = array<i64: 128, 128>}, {pipeline_mode = #tpu.pipeline_mode<synchronous>, transform_indices = @transform_9, window_bounds = array<i64: 13, 128>}, {transform_indices = @transform_10, window_bounds = array<i64: 4, 384>}, {transform_indices = @transform_11, window_bounds = array<i64: 4, 128>}]} {
    %c0 = arith.constant 0 : index
    %c0_0 = arith.constant 0 : index
    %0 = vector.load %arg10[%c0, %c0_0] : memref<13x128xf32, #tpu.memory_space<vmem>>, vector<13x128xf32>
    %1 = vector.extract_strided_slice %0 {offsets = [0, 0], sizes = [3, 128], strides = [1, 1]} : vector<13x128xf32> to vector<3x128xf32>
    %2 = vector.shape_cast %1 : vector<3x128xf32> to vector<3x1x128xf32>
    %3 = vector.extract_strided_slice %0 {offsets = [3, 0], sizes = [1, 128], strides = [1, 1]} : vector<13x128xf32> to vector<1x128xf32>
    %4 = vector.extract_strided_slice %0 {offsets = [4, 0], sizes = [1, 128], strides = [1, 1]} : vector<13x128xf32> to vector<1x128xf32>
    %5 = vector.extract_strided_slice %0 {offsets = [5, 0], sizes = [1, 128], strides = [1, 1]} : vector<13x128xf32> to vector<1x128xf32>
    %6 = vector.extract_strided_slice %0 {offsets = [6, 0], sizes = [1, 128], strides = [1, 1]} : vector<13x128xf32> to vector<1x128xf32>
    %7 = vector.extract_strided_slice %0 {offsets = [7, 0], sizes = [1, 128], strides = [1, 1]} : vector<13x128xf32> to vector<1x128xf32>
    %8 = vector.extract_strided_slice %0 {offsets = [8, 0], sizes = [1, 128], strides = [1, 1]} : vector<13x128xf32> to vector<1x128xf32>
    %9 = vector.extract_strided_slice %0 {offsets = [9, 0], sizes = [1, 128], strides = [1, 1]} : vector<13x128xf32> to vector<1x128xf32>
    %10 = vector.extract_strided_slice %0 {offsets = [10, 0], sizes = [1, 128], strides = [1, 1]} : vector<13x128xf32> to vector<1x128xf32>
    %11 = vector.extract_strided_slice %0 {offsets = [11, 0], sizes = [1, 128], strides = [1, 1]} : vector<13x128xf32> to vector<1x128xf32>
    %12 = vector.extract_strided_slice %0 {offsets = [12, 0], sizes = [1, 128], strides = [1, 1]} : vector<13x128xf32> to vector<1x128xf32>
    %c0_1 = arith.constant 0 : index
    %c0_2 = arith.constant 0 : index
    %c0_3 = arith.constant 0 : index
    %13 = vector.load %arg1[%c0_1, %c0_2, %c0_3] : memref<3x4x128xbf16, #tpu.memory_space<vmem>>, vector<3x4x128xbf16>
    %c0_4 = arith.constant 0 : index
    %c0_5 = arith.constant 0 : index
    %c0_6 = arith.constant 0 : index
    %14 = vector.load %arg2[%c0_4, %c0_5, %c0_6] : memref<3x128x128xbf16, #tpu.memory_space<vmem>>, vector<3x128x128xbf16>
    "tpu.trace_start"() <{level = 10 : i32, message = "mbd,mdh->mbh"}> : () -> ()
    %cst = arith.constant dense<0.000000e+00> : vector<3x4x128xf32>
    %15 = tpu.matmul %13, %14, %cst {dimension_numbers = #tpu.dot_dimension_numbers<[2], [1], [1], [2], [0, 0, 0, 1, 1, 2], [0], [0]>} : vector<3x4x128xbf16>, vector<3x128x128xbf16>, vector<3x4x128xf32> -> vector<3x4x128xf32>
    "tpu.trace_stop"() : () -> ()
    %16 = vector.broadcast %2 : vector<3x1x128xf32> to vector<3x4x128xf32>
    %17 = arith.addf %15, %16 : vector<3x4x128xf32>
    %18 = vector.extract_strided_slice %17 {offsets = [0, 0, 0], sizes = [1, 4, 128], strides = [1, 1, 1]} : vector<3x4x128xf32> to vector<1x4x128xf32>
    %19 = vector.shape_cast %18 : vector<1x4x128xf32> to vector<4x128xf32>
    %20 = vector.extract_strided_slice %17 {offsets = [1, 0, 0], sizes = [1, 4, 128], strides = [1, 1, 1]} : vector<3x4x128xf32> to vector<1x4x128xf32>
    %21 = vector.shape_cast %20 : vector<1x4x128xf32> to vector<4x128xf32>
    %22 = vector.extract_strided_slice %17 {offsets = [2, 0, 0], sizes = [1, 4, 128], strides = [1, 1, 1]} : vector<3x4x128xf32> to vector<1x4x128xf32>
    %23 = vector.shape_cast %22 : vector<1x4x128xf32> to vector<4x128xf32>
    %24 = tpu.concatenate %19, %21, %23 in 1 : vector<4x128xf32>, vector<4x128xf32>, vector<4x128xf32> -> vector<4x384xf32>
    %c0_7 = arith.constant 0 : index
    %c0_8 = arith.constant 0 : index
    %25 = vector.load %arg11[%c0_7, %c0_8] : memref<4x384xf32, #tpu.memory_space<vmem>>, vector<4x384xf32>
    tpu.vector_store %arg11[%c0_7, %c0_8], %24 {strides = array<i32>} : memref<4x384xf32, #tpu.memory_space<vmem>>, vector<4x384xf32>,
    %26 = vector.shape_cast %17 : vector<3x4x128xf32> to vector<12x128xf32>
    %27 = arith.truncf %26 : vector<12x128xf32> to vector<12x128xbf16>
    %c0_9 = arith.constant 0 : index
    %c0_10 = arith.constant 0 : index
    %28 = vector.load %arg3[%c0_9, %c0_10] : memref<128x384xbf16, #tpu.memory_space<vmem>>, vector<128x384xbf16>
    %cst_11 = arith.constant dense<0.000000e+00> : vector<12x384xf32>
    %29 = tpu.matmul %27, %28, %cst_11 {dimension_numbers = #tpu.dot_dimension_numbers<[1], [0], [0], [1], [0, 0, 1, 1], [], []>} : vector<12x128xbf16>, vector<128x384xbf16>, vector<12x384xf32> -> vector<12x384xf32>
    %30 = vector.extract_strided_slice %29 {offsets = [0, 0], sizes = [12, 128], strides = [1, 1]} : vector<12x384xf32> to vector<12x128xf32>
    %31 = vector.broadcast %3 : vector<1x128xf32> to vector<12x128xf32>
    %32 = arith.addf %30, %31 : vector<12x128xf32>
    %33 = vector.shape_cast %32 : vector<12x128xf32> to vector<3x4x128xf32>
    %34 = vector.extract_strided_slice %29 {offsets = [0, 128], sizes = [12, 128], strides = [1, 1]} : vector<12x384xf32> to vector<12x128xf32>
    %35 = vector.broadcast %4 : vector<1x128xf32> to vector<12x128xf32>
    %36 = arith.addf %34, %35 : vector<12x128xf32>
    %37 = vector.shape_cast %36 : vector<12x128xf32> to vector<3x4x128xf32>
    %38 = vector.extract_strided_slice %29 {offsets = [0, 256], sizes = [12, 128], strides = [1, 1]} : vector<12x384xf32> to vector<12x128xf32>
    %39 = vector.broadcast %5 : vector<1x128xf32> to vector<12x128xf32>
    %40 = arith.addf %38, %39 : vector<12x128xf32>
    %41 = vector.shape_cast %40 : vector<12x128xf32> to vector<3x4x128xf32>
    %42 = vector.shape_cast %33 : vector<3x4x128xf32> to vector<3x1x4x128xf32>
    %43 = vector.shape_cast %37 : vector<3x4x128xf32> to vector<1x3x4x128xf32>
    %44 = vector.broadcast %42 : vector<3x1x4x128xf32> to vector<3x3x4x128xf32>
    %45 = vector.broadcast %43 : vector<1x3x4x128xf32> to vector<3x3x4x128xf32>
    %46 = arith.mulf %44, %45 : vector<3x3x4x128xf32>
    %47 = vector.shape_cast %46 : vector<3x3x4x128xf32> to vector<36x128xf32>
    %48 = arith.truncf %47 : vector<36x128xf32> to vector<36x128xbf16>
    %c0_12 = arith.constant 0 : index
    %c0_13 = arith.constant 0 : index
    %49 = vector.load %arg9[%c0_12, %c0_13] : memref<128x128xbf16, #tpu.memory_space<vmem>>, vector<128x128xbf16>
    %cst_14 = arith.constant dense<0.000000e+00> : vector<36x128xf32>
    %50 = tpu.matmul %48, %49, %cst_14 {dimension_numbers = #tpu.dot_dimension_numbers<[1], [0], [0], [1], [0, 0, 1, 1], [], []>} : vector<36x128xbf16>, vector<128x128xbf16>, vector<36x128xf32> -> vector<36x128xf32>
    %51 = vector.shape_cast %50 : vector<36x128xf32> to vector<3x3x4x128xf32>
    %cst_15 = arith.constant dense<0xFF800000> : vector<3x4x128xf32>
    %52 = vector.multi_reduction <maximumf>, %51, %cst_15 [1] : vector<3x3x4x128xf32> to vector<3x4x128xf32>
    %53 = vector.shape_cast %52 : vector<3x4x128xf32> to vector<3x1x4x128xf32>
    %54 = vector.broadcast %53 : vector<3x1x4x128xf32> to vector<3x3x4x128xf32>
    %55 = arith.subf %51, %54 : vector<3x3x4x128xf32>
    %56 = math.exp %55 : vector<3x3x4x128xf32>
    %cst_16 = arith.constant dense<0.000000e+00> : vector<3x4x128xf32>
    %57 = vector.multi_reduction <add>, %56, %cst_16 [1] : vector<3x3x4x128xf32> to vector<3x4x128xf32>
    %58 = vector.shape_cast %57 : vector<3x4x128xf32> to vector<3x1x4x128xf32>
    %59 = tpu.reciprocal %58 {approx = true} : vector<3x1x4x128xf32> -> vector<3x1x4x128xf32>
    %60 = vector.broadcast %59 : vector<3x1x4x128xf32> to vector<3x3x4x128xf32>
    %61 = arith.mulf %56, %60 : vector<3x3x4x128xf32>
    %62 = vector.shape_cast %41 : vector<3x4x128xf32> to vector<1x3x4x128xf32>
    %63 = vector.broadcast %62 : vector<1x3x4x128xf32> to vector<3x3x4x128xf32>
    %64 = arith.mulf %61, %63 : vector<3x3x4x128xf32>
    %cst_17 = arith.constant dense<0.000000e+00> : vector<3x4x128xf32>
    %65 = vector.multi_reduction <add>, %64, %cst_17 [1] : vector<3x3x4x128xf32> to vector<3x4x128xf32>
    %66 = vector.shape_cast %65 : vector<3x4x128xf32> to vector<12x128xf32>
    %67 = arith.truncf %66 : vector<12x128xf32> to vector<12x128xbf16>
    %c0_18 = arith.constant 0 : index
    %c0_19 = arith.constant 0 : index
    %68 = vector.load %arg4[%c0_18, %c0_19] : memref<128x128xbf16, #tpu.memory_space<vmem>>, vector<128x128xbf16>
    %cst_20 = arith.constant dense<0.000000e+00> : vector<12x128xf32>
    %69 = tpu.matmul %67, %68, %cst_20 {dimension_numbers = #tpu.dot_dimension_numbers<[1], [0], [0], [1], [0, 0, 1, 1], [], []>} : vector<12x128xbf16>, vector<128x128xbf16>, vector<12x128xf32> -> vector<12x128xf32>
    %70 = vector.broadcast %6 : vector<1x128xf32> to vector<12x128xf32>
    %71 = arith.addf %69, %70 : vector<12x128xf32>
    %72 = arith.addf %71, %26 : vector<12x128xf32>
    %cst_21 = arith.constant dense<0.000000e+00> : vector<12xf32>
    %73 = vector.multi_reduction <add>, %72, %cst_21 [1] : vector<12x128xf32> to vector<12xf32>
    %74 = vector.shape_cast %73 : vector<12xf32> to vector<12x1xf32>
    %cst_22 = arith.constant 1.280000e+02 : f32
    %75 = vector.broadcast %cst_22 : f32 to vector<12x1xf32>
    %76 = arith.divf %74, %75 : vector<12x1xf32>
    %77 = vector.broadcast %76 : vector<12x1xf32> to vector<12x128xf32>
    %78 = arith.subf %72, %77 : vector<12x128xf32>
    %79 = arith.mulf %78, %78 : vector<12x128xf32>
    %cst_23 = arith.constant dense<0.000000e+00> : vector<12xf32>
    %80 = vector.multi_reduction <add>, %79, %cst_23 [1] : vector<12x128xf32> to vector<12xf32>
    %81 = vector.shape_cast %80 : vector<12xf32> to vector<12x1xf32>
    %cst_24 = arith.constant 1.280000e+02 : f32
    %82 = vector.broadcast %cst_24 : f32 to vector<12x1xf32>
    %83 = arith.divf %81, %82 : vector<12x1xf32>
    %84 = vector.broadcast %76 : vector<12x1xf32> to vector<12x128xf32>
    %85 = arith.subf %72, %84 : vector<12x128xf32>
    %cst_25 = arith.constant 9.99999974E-6 : f32
    %86 = vector.broadcast %cst_25 : f32 to vector<12x1xf32>
    %87 = arith.addf %83, %86 : vector<12x1xf32>
    %88 = math.rsqrt %87 : vector<12x1xf32>
    %89 = vector.broadcast %88 : vector<12x1xf32> to vector<12x128xf32>
    %90 = arith.mulf %85, %89 : vector<12x128xf32>
    %91 = vector.broadcast %7 : vector<1x128xf32> to vector<12x128xf32>
    %92 = arith.mulf %90, %91 : vector<12x128xf32>
    %93 = vector.broadcast %8 : vector<1x128xf32> to vector<12x128xf32>
    %94 = arith.addf %92, %93 : vector<12x128xf32>
    %95 = arith.truncf %94 : vector<12x128xf32> to vector<12x128xbf16>
    %c0_26 = arith.constant 0 : index
    %c0_27 = arith.constant 0 : index
    %96 = vector.load %arg5[%c0_26, %c0_27] : memref<128x512xbf16, #tpu.memory_space<vmem>>, vector<128x512xbf16>
    %cst_28 = arith.constant dense<0.000000e+00> : vector<12x512xf32>
    %97 = tpu.matmul %95, %96, %cst_28 {dimension_numbers = #tpu.dot_dimension_numbers<[1], [0], [0], [1], [0, 0, 1, 1], [], []>} : vector<12x128xbf16>, vector<128x512xbf16>, vector<12x512xf32> -> vector<12x512xf32>
    %c0_29 = arith.constant 0 : index
    %c0_30 = arith.constant 0 : index
    %98 = vector.load %arg6[%c0_29, %c0_30] : memref<1x512xf32, #tpu.memory_space<vmem>>, vector<1x512xf32>
    %99 = vector.broadcast %98 : vector<1x512xf32> to vector<12x512xf32>
    %100 = arith.addf %97, %99 : vector<12x512xf32>
    %cst_31 = arith.constant 0.000000e+00 : f32
    %101 = vector.broadcast %cst_31 : f32 to vector<12x512xf32>
    %102 = arith.maximumf %100, %101 : vector<12x512xf32>
    %103 = arith.truncf %102 : vector<12x512xf32> to vector<12x512xbf16>
    %c0_32 = arith.constant 0 : index
    %c0_33 = arith.constant 0 : index
    %104 = vector.load %arg7[%c0_32, %c0_33] : memref<512x128xbf16, #tpu.memory_space<vmem>>, vector<512x128xbf16>
    %cst_34 = arith.constant dense<0.000000e+00> : vector<12x128xf32>
    %105 = tpu.matmul %103, %104, %cst_34 {dimension_numbers = #tpu.dot_dimension_numbers<[1], [0], [0], [1], [0, 0, 1, 1], [], []>} : vector<12x512xbf16>, vector<512x128xbf16>, vector<12x128xf32> -> vector<12x128xf32>
    %106 = vector.broadcast %11 : vector<1x128xf32> to vector<12x128xf32>
    %107 = arith.addf %105, %106 : vector<12x128xf32>
    %108 = arith.addf %94, %107 : vector<12x128xf32>
    %cst_35 = arith.constant dense<0.000000e+00> : vector<12xf32>
    %109 = vector.multi_reduction <add>, %108, %cst_35 [1] : vector<12x128xf32> to vector<12xf32>
    %110 = vector.shape_cast %109 : vector<12xf32> to vector<12x1xf32>
    %cst_36 = arith.constant 1.280000e+02 : f32
    %111 = vector.broadcast %cst_36 : f32 to vector<12x1xf32>
    %112 = arith.divf %110, %111 : vector<12x1xf32>
    %113 = vector.broadcast %112 : vector<12x1xf32> to vector<12x128xf32>
    %114 = arith.subf %108, %113 : vector<12x128xf32>
    %115 = arith.mulf %114, %114 : vector<12x128xf32>
    %cst_37 = arith.constant dense<0.000000e+00> : vector<12xf32>
    %116 = vector.multi_reduction <add>, %115, %cst_37 [1] : vector<12x128xf32> to vector<12xf32>
    %117 = vector.shape_cast %116 : vector<12xf32> to vector<12x1xf32>
    %cst_38 = arith.constant 1.280000e+02 : f32
    %118 = vector.broadcast %cst_38 : f32 to vector<12x1xf32>
    %119 = arith.divf %117, %118 : vector<12x1xf32>
    %120 = vector.broadcast %112 : vector<12x1xf32> to vector<12x128xf32>
    %121 = arith.subf %108, %120 : vector<12x128xf32>
    %cst_39 = arith.constant 9.99999974E-6 : f32
    %122 = vector.broadcast %cst_39 : f32 to vector<12x1xf32>
    %123 = arith.addf %119, %122 : vector<12x1xf32>
    %124 = math.rsqrt %123 : vector<12x1xf32>
    %125 = vector.broadcast %124 : vector<12x1xf32> to vector<12x128xf32>
    %126 = arith.mulf %121, %125 : vector<12x128xf32>
    %127 = vector.broadcast %9 : vector<1x128xf32> to vector<12x128xf32>
    %128 = arith.mulf %126, %127 : vector<12x128xf32>
    %129 = vector.broadcast %10 : vector<1x128xf32> to vector<12x128xf32>
    %130 = arith.addf %128, %129 : vector<12x128xf32>
    %131 = vector.shape_cast %130 : vector<12x128xf32> to vector<3x4x128xf32>
    %cst_40 = arith.constant dense<0.000000e+00> : vector<4x128xf32>
    %132 = vector.multi_reduction <add>, %131, %cst_40 [0] : vector<3x4x128xf32> to vector<4x128xf32>
    %cst_41 = arith.constant 3.000000e+00 : f32
    %133 = vector.broadcast %cst_41 : f32 to vector<4x128xf32>
    %134 = arith.divf %132, %133 : vector<4x128xf32>
    %135 = arith.truncf %134 : vector<4x128xf32> to vector<4x128xbf16>
    %c0_42 = arith.constant 0 : index
    %c0_43 = arith.constant 0 : index
    %136 = vector.load %arg8[%c0_42, %c0_43] : memref<128x128xbf16, #tpu.memory_space<vmem>>, vector<128x128xbf16>
    %cst_44 = arith.constant dense<0.000000e+00> : vector<4x128xf32>
    %137 = tpu.matmul %135, %136, %cst_44 {dimension_numbers = #tpu.dot_dimension_numbers<[1], [0], [0], [1], [0, 0, 1, 1], [], []>} : vector<4x128xbf16>, vector<128x128xbf16>, vector<4x128xf32> -> vector<4x128xf32>
    %138 = vector.broadcast %12 : vector<1x128xf32> to vector<4x128xf32>
    %139 = arith.addf %137, %138 : vector<4x128xf32>
    %cst_45 = arith.constant 0.000000e+00 : f32
    %140 = vector.broadcast %cst_45 : f32 to vector<4x128xf32>
    %141 = arith.maximumf %139, %140 : vector<4x128xf32>
    %c0_46 = arith.constant 0 : index
    %c0_47 = arith.constant 0 : index
    %142 = vector.load %arg12[%c0_46, %c0_47] : memref<4x128xf32, #tpu.memory_space<vmem>>, vector<4x128xf32>
    tpu.vector_store %arg12[%c0_46, %c0_47], %141 {strides = array<i32>} : memref<4x128xf32, #tpu.memory_space<vmem>>, vector<4x128xf32>,
    return
  }
  func.func @transform_0(%arg0: i32) -> (i32, i32, i32) {
    %c0_i32 = arith.constant 0 : i32
    %c0_i32_0 = arith.constant 0 : i32
    %c0_i32_1 = arith.constant 0 : i32
    return %c0_i32, %arg0, %c0_i32_0 : i32, i32, i32
  }
  func.func @transform_1(%arg0: i32) -> (i32, i32, i32) {
    %c0_i32 = arith.constant 0 : i32
    %c0_i32_0 = arith.constant 0 : i32
    %c0_i32_1 = arith.constant 0 : i32
    %c0_i32_2 = arith.constant 0 : i32
    return %c0_i32, %c0_i32_0, %c0_i32_1 : i32, i32, i32
  }
  func.func @transform_2(%arg0: i32) -> (i32, i32) {
    %c0_i32 = arith.constant 0 : i32
    %c0_i32_0 = arith.constant 0 : i32
    %c0_i32_1 = arith.constant 0 : i32
    return %c0_i32, %c0_i32_0 : i32, i32
  }
  func.func @transform_3(%arg0: i32) -> (i32, i32) {
    %c0_i32 = arith.constant 0 : i32
    %c0_i32_0 = arith.constant 0 : i32
    %c0_i32_1 = arith.constant 0 : i32
    return %c0_i32, %c0_i32_0 : i32, i32
  }
  func.func @transform_4(%arg0: i32) -> (i32, i32) {
    %c0_i32 = arith.constant 0 : i32
    %c0_i32_0 = arith.constant 0 : i32
    %c0_i32_1 = arith.constant 0 : i32
    return %c0_i32, %c0_i32_0 : i32, i32
  }
  func.func @transform_5(%arg0: i32) -> (i32, i32) {
    %c0_i32 = arith.constant 0 : i32
    %c0_i32_0 = arith.constant 0 : i32
    %c0_i32_1 = arith.constant 0 : i32
    return %c0_i32, %c0_i32_0 : i32, i32
  }
  func.func @transform_6(%arg0: i32) -> (i32, i32) {
    %c0_i32 = arith.constant 0 : i32
    %c0_i32_0 = arith.constant 0 : i32
    %c0_i32_1 = arith.constant 0 : i32
    return %c0_i32, %c0_i32_0 : i32, i32
  }
  func.func @transform_7(%arg0: i32) -> (i32, i32) {
    %c0_i32 = arith.constant 0 : i32
    %c0_i32_0 = arith.constant 0 : i32
    %c0_i32_1 = arith.constant 0 : i32
    return %c0_i32, %c0_i32_0 : i32, i32
  }
  func.func @transform_8(%arg0: i32) -> (i32, i32) {
    %c0_i32 = arith.constant 0 : i32
    %c0_i32_0 = arith.constant 0 : i32
    %c0_i32_1 = arith.constant 0 : i32
    return %c0_i32, %c0_i32_0 : i32, i32
  }
  func.func @transform_9(%arg0: i32) -> (i32, i32) {
    %c0_i32 = arith.constant 0 : i32
    %c0_i32_0 = arith.constant 0 : i32
    %c0_i32_1 = arith.constant 0 : i32
    return %c0_i32, %c0_i32_0 : i32, i32
  }
  func.func @transform_10(%arg0: i32) -> (i32, i32) {
    %c0_i32 = arith.constant 0 : i32
    %c0_i32_0 = arith.constant 0 : i32
    return %arg0, %c0_i32 : i32, i32
  }
  func.func @transform_11(%arg0: i32) -> (i32, i32) {
    %c0_i32 = arith.constant 0 : i32
    %c0_i32_0 = arith.constant 0 : i32
    return %arg0, %c0_i32 : i32, i32
  }
}

</mosaic_0001>

<bundles_post_ra>
// kernel: tpu_custom_call.1
= control target key start
LH: loop header
LB: loop body
LE: loop exit
PB: predicated region body
PF: predicated region fallthrough
CT: control target
= control target key end

     0   :  { %17 = vsyncpa [#allocation3], 0  ;;  %s3306_s0 = inlined_call_operand.hbm [shape: bf16[3,4,128], index: 0, kind: input, shape index: {}]   ;;  %s3307_s1 = inlined_call_operand.hbm [shape: bf16[3,128,128], index: 1, kind: input, shape index: {}]   ;;  %s3308_s2 = inlined_call_operand.hbm [shape: bf16[128,384], index: 2, kind: input, shape index: {}]   ;;  %s3309_s3 = inlined_call_operand.hbm [shape: bf16[128,128], index: 3, kind: input, shape index: {}]   ;;  %s3310_s4 = inlined_call_operand.hbm [shape: bf16[128,512], index: 4, kind: input, shape index: {}]   ;;  %s3311_s5 = inlined_call_operand.vmem [shape: f32[1,512], index: 5, kind: input, shape index: {}]   ;;  %s3312_s6 = inlined_call_operand.hbm [shape: bf16[512,128], index: 6, kind: input, shape index: {}]   ;;  %s3313_s7 = inlined_call_operand.hbm [shape: bf16[128,128], index: 7, kind: input, shape index: {}]   ;;  %s3314_s8 = inlined_call_operand.hbm [shape: bf16[128,128], index: 8, kind: input, shape index: {}]   ;;  %s3315_s9 = inlined_call_operand.vmem [shape: f32[13,128], index: 9, kind: input, shape index: {}]   ;;  %s3316_s10 = inlined_call_operand.hbm [shape: f32[4,384], index: 10, kind: output, shape index: {0}]   ;;  %s3317_s11 = inlined_call_operand.hbm [shape: f32[4,128], index: 11, kind: output, shape index: {1}]  }
   0x1   :  { %18 = vsyncpa [#allocation6], 0 }
   0x2   :  { %19 = vsyncpa [#allocation9], 0 }
   0x3   :  { %20 = vsyncpa [#allocation12], 0 }
   0x4   :  { %21 = vsyncpa [#allocation15], 0 }
   0x5   :  { %22 = vsyncpa [#allocation4], 0 }
   0x6   :  { %23 = vsyncpa [#allocation18], 0  ;;  %s2878_s17 = smov [#allocation5]   ;;  %s2644_s21 = scalar_lea.hbm %s3307_s1, 3072 }
   0x7   :  { %s41_s18 = sshll.u32 %s2878_s17, 4  ;;  %p2645_p0 = scmp.ne.s32.totalorder %s3307_s1, %s2644_s21  ;;  %s42_s18 = int_to_ptr.vmem [resolvable:$true] %s41_s18 }
   0x8   :  { %p2648_p1 = scmp.lt.u32.totalorder %s2644_s21, %s3307_s1 }
   0xa   :  { %p2650_p2 = pnand %p2648_p1, %p2645_p0 }
   0xc   :  { %2653 = shalt.err (!%p2650_p2)
}
   0xd   :  { %s2654_s26 = scalar_lea.vmem %s42_s18, 3072  ;;  %p2659_p4 = scmp.lt.s32.totalorder %s42_s18, %s42_s18 }
   0xe   :  { %p2655_p3 = scmp.ne.s32.totalorder %s42_s18, %s2654_s26  ;;  %p2660_p5 = scmp.lt.s32.totalorder %s2654_s26, %s2654_s26 }
  0x10   :  { %p2661_p6 = por %p2660_p5, %p2659_p4 }
  0x12   :  { %p2662_p7 = pnand %p2661_p6, %p2655_p3 }
  0x14   :  { %2665 = shalt.err (!%p2662_p7)
}
  0x15   :  { %s2879_s27 = smov 64   ;;  %s2880_s28 = smov 4  }
  0x16   :  { %47 = dma.hbm_to_vmem [thread:$0]  %s3307_s1, 3072, %s42_s18, [#allocation6], %s2879_s27, %s2879_s27, %s2880_s28  }
  0x17   :  { %s2881_s12 = smov [#allocation8]   ;;  %s2882_s14 = smov [#allocation11]  }
  0x18   :  { %s65_s13 = sshll.u32 %s2881_s12, 4  ;;  %s91_s15 = sshll.u32 %s2882_s14, 4  ;;  %s66_s13 = int_to_ptr.vmem [resolvable:$true] %s65_s13  ;;  %s92_s15 = int_to_ptr.vmem [resolvable:$true] %s91_s15 }
  0x19   :  { %s2666_s19 = scalar_lea.hbm %s3309_s3, 1024 }
  0x1a   :  { %p2667_p8 = scmp.ne.s32.totalorder %s3309_s3, %s2666_s19  ;;  %p2670_p9 = scmp.lt.u32.totalorder %s2666_s19, %s3309_s3 }
  0x1c   :  { %p2672_p10 = pnand %p2670_p9, %p2667_p8 }
  0x1e   :  { %2675 = shalt.err (!%p2672_p10)
}
  0x1f   :  { %s2676_s1 = scalar_lea.vmem %s66_s13, 1024  ;;  %p2681_p12 = scmp.lt.s32.totalorder %s66_s13, %s66_s13 }
  0x20   :  { %p2677_p11 = scmp.ne.s32.totalorder %s66_s13, %s2676_s1  ;;  %p2682_p13 = scmp.lt.s32.totalorder %s2676_s1, %s2676_s1 }
  0x22   :  { %p2683_p0 = por %p2682_p13, %p2681_p12 }
  0x24   :  { %p2684_p1 = pnand %p2683_p0, %p2677_p11 }
  0x26   :  { %2687 = shalt.err (!%p2684_p1)
}
  0x27   :  { %71 = dma.hbm_to_vmem [thread:$0]  %s3309_s3, 1024, %s66_s13, [#allocation9], %s2879_s27, %s2879_s27, %s2880_s28  }
  0x28   :  { %s2688_s29 = scalar_lea.hbm %s3312_s6, 4096 }
  0x29   :  { %p2689_p2 = scmp.ne.s32.totalorder %s3312_s6, %s2688_s29  ;;  %p2692_p3 = scmp.lt.u32.totalorder %s2688_s29, %s3312_s6 }
  0x2b   :  { %p2694_p4 = pnand %p2692_p3, %p2689_p2 }
  0x2d   :  { %2697 = shalt.err (!%p2694_p4)
}
  0x2e   :  { %s2698_s17 = scalar_lea.vmem %s92_s15, 4096  ;;  %p2703_p6 = scmp.lt.s32.totalorder %s92_s15, %s92_s15 }
  0x2f   :  { %p2699_p5 = scmp.ne.s32.totalorder %s92_s15, %s2698_s17  ;;  %p2704_p7 = scmp.lt.s32.totalorder %s2698_s17, %s2698_s17 }
  0x31   :  { %p2705_p8 = por %p2704_p7, %p2703_p6 }
  0x33   :  { %p2706_p9 = pnand %p2705_p8, %p2699_p5 }
  0x35   :  { %2709 = shalt.err (!%p2706_p9)
}
  0x36   :  { %97 = dma.hbm_to_vmem [thread:$0]  %s3312_s6, 4096, %s92_s15, [#allocation12], %s2879_s27, %s2879_s27, %s2880_s28  }
  0x37   :  { %s2883_s19 = smov [#allocation2]   ;;  %s2710_s23 = scalar_lea.hbm %s3306_s0, 96 }
  0x38   :  { %s29_s20 = sshll.u32 %s2883_s19, 4  ;;  %p2711_p10 = scmp.ne.s32.totalorder %s3306_s0, %s2710_s23  ;;  %s30_s20 = int_to_ptr.vmem [resolvable:$true] %s29_s20 }
  0x39   :  { %p2714_p11 = scmp.lt.u32.totalorder %s2710_s23, %s3306_s0 }
  0x3b   :  { %p2716_p12 = pnand %p2714_p11, %p2711_p10 }
  0x3d   :  { %2719 = shalt.err (!%p2716_p12)
}
  0x3e   :  { %s2720_s26 = scalar_lea.vmem %s30_s20, 96  ;;  %p2725_p0 = scmp.lt.s32.totalorder %s30_s20, %s30_s20 }
  0x3f   :  { %p2721_p13 = scmp.ne.s32.totalorder %s30_s20, %s2720_s26  ;;  %p2726_p1 = scmp.lt.s32.totalorder %s2720_s26, %s2720_s26 }
  0x41   :  { %p2727_p2 = por %p2726_p1, %p2725_p0 }
  0x43   :  { %p2728_p3 = pnand %p2727_p2, %p2721_p13 }
  0x45   :  { %2731 = shalt.err (!%p2728_p3)
}
  0x46   :  { %s2884_s6 = smov 32   ;;  %s2885_s15 = smov 2  }
  0x47   :  { %35 = dma.hbm_to_vmem [thread:$0]  %s3306_s0, 96, %s30_s20, [#allocation3], %s2884_s6, %s2884_s6, %s2885_s15  }
  0x48   :  { %s2886_s12 = smov [#allocation7]   ;;  %s2732_s3 = scalar_lea.hbm %s3308_s2, 3072 }
  0x49   :  { %s53_s14 = sshll.u32 %s2886_s12, 4  ;;  %p2733_p4 = scmp.ne.s32.totalorder %s3308_s2, %s2732_s3  ;;  %s54_s14 = int_to_ptr.vmem [resolvable:$true] %s53_s14 }
  0x4a   :  { %p2736_p5 = scmp.lt.u32.totalorder %s2732_s3, %s3308_s2 }
  0x4c   :  { %p2738_p6 = pnand %p2736_p5, %p2733_p4 }
  0x4e   :  { %2741 = shalt.err (!%p2738_p6)
}
  0x4f   :  { %s2742_s23 = scalar_lea.vmem %s54_s14, 3072  ;;  %p2747_p8 = scmp.lt.s32.totalorder %s54_s14, %s54_s14 }
  0x50   :  { %p2743_p7 = scmp.ne.s32.totalorder %s54_s14, %s2742_s23  ;;  %p2748_p9 = scmp.lt.s32.totalorder %s2742_s23, %s2742_s23 }
  0x52   :  { %p2749_p10 = por %p2748_p9, %p2747_p8 }
  0x54   :  { %p2750_p11 = pnand %p2749_p10, %p2743_p7 }
  0x56   :  { %2753 = shalt.err (!%p2750_p11)
}
  0x57   :  { %s2887_s0 = smov 192   ;;  %s2888_s20 = smov 12  }
  0x58   :  { %59 = dma.hbm_to_vmem [thread:$0]  %s3308_s2, 3072, %s54_s14, [#allocation6], %s2887_s0, %s2887_s0, %s2888_s20  }
  0x59   :  { %s2889_s24 = smov [#allocation10]   ;;  %s2754_s15 = scalar_lea.hbm %s3310_s4, 4096 }
  0x5a   :  { %s77_s25 = sshll.u32 %s2889_s24, 4  ;;  %p2755_p12 = scmp.ne.s32.totalorder %s3310_s4, %s2754_s15  ;;  %s78_s25 = int_to_ptr.vmem [resolvable:$true] %s77_s25 }
  0x5b   :  { %p2758_p13 = scmp.lt.u32.totalorder %s2754_s15, %s3310_s4 }
  0x5d   :  { %p2760_p0 = pnand %p2758_p13, %p2755_p12 }
  0x5f   :  { %2763 = shalt.err (!%p2760_p0)
}
  0x60   :  { %s2764_s17 = scalar_lea.vmem %s78_s25, 4096  ;;  %p2769_p2 = scmp.lt.s32.totalorder %s78_s25, %s78_s25 }
  0x61   :  { %p2765_p1 = scmp.ne.s32.totalorder %s78_s25, %s2764_s17  ;;  %p2770_p3 = scmp.lt.s32.totalorder %s2764_s17, %s2764_s17 }
  0x63   :  { %p2771_p4 = por %p2770_p3, %p2769_p2 }
  0x65   :  { %p2772_p5 = pnand %p2771_p4, %p2765_p1 }
  0x67   :  { %2775 = shalt.err (!%p2772_p5)
}
  0x68   :  { %s2890_s2 = smov 256   ;;  %s2891_s14 = smov 16  }
  0x69   :  { %83 = dma.hbm_to_vmem [thread:$0]  %s3310_s4, 4096, %s78_s25, [#allocation9], %s2890_s2, %s2890_s2, %s2891_s14  }
  0x6a   :  { %s2892_s19 = smov [#allocation13]   ;;  %s2893_s22 = smov [#allocation14]  }
  0x6b   :  { %s103_s21 = sshll.u32 %s2892_s19, 4  ;;  %s115_s23 = sshll.u32 %s2893_s22, 4  ;;  %s104_s21 = int_to_ptr.vmem [resolvable:$true] %s103_s21  ;;  %s3041_s23 = int_to_ptr.vmem [resolvable:$true] %s115_s23 }
  0x6c   :  { %s2776_s1 = scalar_lea.hbm %s3313_s7, 1024 }
  0x6d   :  { %p2777_p6 = scmp.ne.s32.totalorder %s3313_s7, %s2776_s1  ;;  %p2780_p7 = scmp.lt.u32.totalorder %s2776_s1, %s3313_s7 }
  0x6f   :  { %p2782_p8 = pnand %p2780_p7, %p2777_p6 }
  0x71   :  { %2785 = shalt.err (!%p2782_p8)
}
  0x72   :  { %s2786_s4 = scalar_lea.vmem %s104_s21, 1024  ;;  %p2791_p10 = scmp.lt.s32.totalorder %s104_s21, %s104_s21 }
  0x73   :  { %p2787_p9 = scmp.ne.s32.totalorder %s104_s21, %s2786_s4  ;;  %p2792_p11 = scmp.lt.s32.totalorder %s2786_s4, %s2786_s4 }
  0x75   :  { %p2793_p12 = por %p2792_p11, %p2791_p10 }
  0x77   :  { %p2794_p13 = pnand %p2793_p12, %p2787_p9 }
  0x79   :  { %2797 = shalt.err (!%p2794_p13)
}
  0x7a   :  { %109 = dma.hbm_to_vmem [thread:$0]  %s3313_s7, 1024, %s104_s21, [#allocation12], %s2879_s27, %s2879_s27, %s2880_s28  }
  0x7b   :  { %s2798_s12 = scalar_lea.hbm %s3314_s8, 1024 }
  0x7c   :  { %p2799_p0 = scmp.ne.s32.totalorder %s3314_s8, %s2798_s12  ;;  %p2802_p1 = scmp.lt.u32.totalorder %s2798_s12, %s3314_s8 }
  0x7e   :  { %p2804_p2 = pnand %p2802_p1, %p2799_p0 }
  0x80   :  { %2807 = shalt.err (!%p2804_p2)
}
  0x81   :  { %s2808_s3 = scalar_lea.vmem %s3041_s23, 1024  ;;  %p2813_p4 = scmp.lt.s32.totalorder %s3041_s23, %s3041_s23 }
  0x82   :  { %p2809_p3 = scmp.ne.s32.totalorder %s3041_s23, %s2808_s3  ;;  %p2814_p5 = scmp.lt.s32.totalorder %s2808_s3, %s2808_s3 }
  0x84   :  { %p2815_p6 = por %p2814_p5, %p2813_p4 }
  0x86   :  { %p2816_p7 = pnand %p2815_p6, %p2809_p3 }
  0x88   :  { %2819 = shalt.err (!%p2816_p7)
}
  0x89   :  { %121 = dma.hbm_to_vmem [thread:$0]  %s3314_s8, 1024, %s3041_s23, [#allocation15], %s2879_s27, %s2879_s27, %s2880_s28  }
  0x8a   :  { %2864 = dma.done.wait [#allocation3], 96  }
  0x8b   :  { %2865 = vsyncadd [#allocation3], 4294967200 }
  0x8c   :  { %2866 = dma.done.wait [#allocation6], 6144  }
  0x8d   :  { %2867 = vsyncadd [#allocation6], 4294961152 }
  0x8e   :  { %2868 = dma.done.wait [#allocation9], 5120  }
  0x8f   :  { %2869 = vsyncadd [#allocation9], 4294962176 }
  0x90   :  { %2870 = dma.done.wait [#allocation12], 5120  }
  0x91   :  { %2871 = vsyncadd [#allocation12], 4294962176 }
  0x92   :  { %2872 = dma.done.wait [#allocation15], 1024  }
  0x93   :  { %2873 = vsyncadd [#allocation15], 4294966272  ;;  %v2894_v0 = vmov 0.0   ;;  %vm2895_vm0 = vmmov 0   ;;  %v2452_v1 = vld [vmem:[#allocation5] sm:$0xff]   ;;  %v2454_v3 = vld [vmem:[#allocation5 + $0x8] sm:$0xff]   ;;  %v155_v55 = vlaneseq }
  0x94   :  { %2282 = vmatprep.subr.bf16.mxu0 %v2894_v0  ;;  %2302 = vmatprep.subr.bf16.mxu1 %v2894_v0  ;;  %v2453_v2 = vld [vmem:[#allocation5 + $0x40] sm:$0xff]   ;;  %v2455_v4 = vld [vmem:[#allocation5 + $0x48] sm:$0xff]   ;;  %v2456_v5 = vld [vmem:[#allocation5 + $0x10] sm:$0xff]   ;;  %v2896_v52 = vmov 0   ;;  %v2897_v53 = vmov 1966171168  }
  0x95   :  { %2298 = vmatprep.mubr.msk.bf16.mxu0 %vm2895_vm0, %v2894_v0  ;;  %2318 = vmatprep.mubr.msk.bf16.mxu1 %vm2895_vm0, %v2894_v0  ;;  %v2457_v6 = vld [vmem:[#allocation5 + $0x50] sm:$0xff]   ;;  %v2458_v7 = vld [vmem:[#allocation5 + $0x18] sm:$0xff]   ;;  %v2460_v9 = vld [vmem:[#allocation5 + $0x20] sm:$0xff]   ;;  %v153_v54 = vunpack.c.l.s4 %v2897_v53  ;;  %v3121_v57 = vshrl.u32 %v155_v55, 7  ;;  %vm940_vm1 = vcmask 1043456  }
  0x96   :  { %2283 = vmatpush3.bf16.msra.mxu0 %v2452_v1  ;;  %2303 = vmatpush3.bf16.msra.mxu1 %v2453_v2  ;;  %v2459_v8 = vld [vmem:[#allocation5 + $0x58] sm:$0xff]   ;;  %v2461_v10 = vld [vmem:[#allocation5 + $0x60] sm:$0xff]   ;;  %v2462_v11 = vld [vmem:[#allocation5 + $0x28] sm:$0xff]  }
  0x97   :  { %2284 = vmatprep.subr.bf16.mxu0 %v2894_v0  ;;  %2304 = vmatprep.subr.bf16.mxu1 %v2894_v0  ;;  %v2463_v12 = vld [vmem:[#allocation5 + $0x68] sm:$0xff]   ;;  %v2464_v13 = vld [vmem:[#allocation5 + $0x30] sm:$0xff]   ;;  %v2466_v15 = vld [vmem:[#allocation5 + $0x38] sm:$0xff]   ;;  %v154_v56 = vunpack.c.0.s8 %v153_v54  ;;  %v3131_v63 = vsub.s32 0, %v3121_v57 }
  0x98   :  { %v2465_v14 = vld [vmem:[#allocation5 + $0x70] sm:$0xff]   ;;  %v2467_v16 = vld [vmem:[#allocation5 + $0x78] sm:$0xff]   ;;  %v2468_v18 = vld [vmem:[#allocation5 + $0x80] sm:$0xff]  }
  0x99   :  { %v175_v17 = vld [vmem:[#allocation2] sm:$0x3]  ;;  %v176_v19 = vld [vmem:[#allocation2 + $0x2] sm:$0x3]  ;;  %v2469_v20 = vld [vmem:[#allocation5 + $0x88] sm:$0xff]   ;;  %v157_v58 = vsub.s32 %v154_v56, %v3121_v57 }
  0x9a   :  { %2285 = vmatpush3.bf16.msra.mxu0 %v2454_v3  ;;  %2305 = vmatpush3.bf16.msra.mxu1 %v2455_v4  ;;  %v2470_v21 = vld [vmem:[#allocation5 + $0x90] sm:$0xff]   ;;  %v2471_v22 = vld [vmem:[#allocation5 + $0x98] sm:$0xff]   ;;  %v2472_v23 = vld [vmem:[#allocation5 + $0xa0] sm:$0xff]  }
  0x9b   :  { %2286 = vmatprep.subr.bf16.mxu0 %v2894_v0  ;;  %2306 = vmatprep.subr.bf16.mxu1 %v2894_v0  ;;  %v2473_v24 = vld [vmem:[#allocation5 + $0xa8] sm:$0xff]   ;;  %v2474_v25 = vld [vmem:[#allocation5 + $0xb0] sm:$0xff]   ;;  %v2475_v26 = vld [vmem:[#allocation5 + $0xb8] sm:$0xff]  }
  0x9c   :  { %v177_v27 = vld [vmem:[#allocation2 + $0x4] sm:$0x3]  ;;  %v2478_v28 = vld [vmem:[#allocation7 + $0x4] ss:$12 sps:$4 sm:$0xff]   ;;  %v2476_v29 = vld [vmem:[#allocation7] ss:$12 sps:$4 sm:$0xff]  }
  0x9d   :  { %v2479_v30 = vld [vmem:[#allocation7 + $0x8] ss:$12 sps:$4 sm:$0xff]   ;;  %v2480_v31 = vld [vmem:[#allocation7 + $0x18] ss:$12 sps:$4 sm:$0xff]   ;;  %v2483_v33 = vld [vmem:[#allocation7 + $0x20] ss:$12 sps:$4 sm:$0xff]  }
  0x9e   :  { %2287 = vmatpush3.bf16.msra.mxu0 %v2456_v5  ;;  %2307 = vmatpush3.bf16.msra.mxu1 %v2457_v6  ;;  %v2482_v32 = vld [vmem:[#allocation7 + $0x1c] ss:$12 sps:$4 sm:$0xff]   ;;  %v2486_v34 = vld [vmem:[#allocation7 + $0x34] ss:$12 sps:$4 sm:$0xff]   ;;  %v2487_v36 = vld [vmem:[#allocation7 + $0x38] ss:$12 sps:$4 sm:$0xff]  }
  0x9f   :  { %2288 = vmatprep.subr.bf16.mxu0 %v2894_v0  ;;  %2308 = vmatprep.subr.bf16.mxu1 %v2894_v0  ;;  %v2484_v35 = vld [vmem:[#allocation7 + $0x30] ss:$12 sps:$4 sm:$0xff]   ;;  %v2490_v37 = vld [vmem:[#allocation7 + $0x4c] ss:$12 sps:$4 sm:$0xff]   ;;  %v2488_v38 = vld [vmem:[#allocation7 + $0x48] ss:$12 sps:$4 sm:$0xff]  }
  0xa0   :  { %v2491_v39 = vld [vmem:[#allocation7 + $0x50] ss:$12 sps:$4 sm:$0xff]   ;;  %v2492_v41 = vld [vmem:[#allocation7 + $0x60] ss:$12 sps:$4 sm:$0xff]   ;;  %v2495_v42 = vld [vmem:[#allocation7 + $0x68] ss:$12 sps:$4 sm:$0xff]  }
  0xa1   :  { %v2494_v40 = vld [vmem:[#allocation7 + $0x64] ss:$12 sps:$4 sm:$0xff]   ;;  %v2498_v43 = vld [vmem:[#allocation7 + $0x7c] ss:$12 sps:$4 sm:$0xff]   ;;  %v2499_v45 = vld [vmem:[#allocation7 + $0x80] ss:$12 sps:$4 sm:$0xff]  }
  0xa2   :  { %2289 = vmatpush3.bf16.msra.mxu0 %v2458_v7  ;;  %2309 = vmatpush3.bf16.msra.mxu1 %v2459_v8  ;;  %v2496_v44 = vld [vmem:[#allocation7 + $0x78] ss:$12 sps:$4 sm:$0xff]   ;;  %v2502_v46 = vld [vmem:[#allocation7 + $0x94] ss:$12 sps:$4 sm:$0xff]   ;;  %v2500_v47 = vld [vmem:[#allocation7 + $0x90] ss:$12 sps:$4 sm:$0xff]  }
  0xa3   :  { %2290 = vmatprep.subr.bf16.mxu0 %v2894_v0  ;;  %2310 = vmatprep.subr.bf16.mxu1 %v2894_v0  ;;  %v2503_v48 = vld [vmem:[#allocation7 + $0x98] ss:$12 sps:$4 sm:$0xff]   ;;  %v2504_v50 = vld [vmem:[#allocation7 + $0xa8] ss:$12 sps:$4 sm:$0xff]   ;;  %v2507_v51 = vld [vmem:[#allocation7 + $0xb0] ss:$12 sps:$4 sm:$0xff]  }
  0xa4   :  { %v2506_v49 = vld [vmem:[#allocation7 + $0xac] ss:$12 sps:$4 sm:$0xff]  }
  0xa5   :  { %v3127_v59 = vld [vmem:[%s3315_s9] sm:$0xff] }
  0xa6   :  { %2291 = vmatpush3.bf16.msra.mxu0 %v2460_v9  ;;  %2311 = vmatpush3.bf16.msra.mxu1 %v2461_v10  ;;  %v158_v60 = vrot.slane %v3127_v59, %v157_v58 }
  0xa7   :  { %2292 = vmatprep.subr.bf16.mxu0 %v2894_v0  ;;  %2312 = vmatprep.subr.bf16.mxu1 %v2894_v0 }
  0xa8   :  { %v159_v61 = vcombine.high %v158_v60, %v158_v60  ;;  %v166_v62 = vrot.slane %v158_v60, %v157_v58 }
  0xaa   :  { %2293 = vmatpush3.bf16.msra.mxu0 %v2462_v11  ;;  %2313 = vmatpush3.bf16.msra.mxu1 %v2463_v12  ;;  %v173_v1 = vrot.slane %v159_v61, %v157_v58  ;;  %v229_v2 = vrot.slane %v166_v62, %v3131_v63 }
  0xab   :  { %2294 = vmatprep.subr.bf16.mxu0 %v2894_v0  ;;  %2314 = vmatprep.subr.bf16.mxu1 %v2894_v0 }
  0xac   :  { %v233_v3 = vrot.slane %v173_v1, %v3131_v63 }
  0xae   :  { %2295 = vmatpush3.bf16.msra.mxu0 %v2464_v13  ;;  %2315 = vmatpush3.bf16.msra.mxu1 %v2465_v14 }
  0xaf   :  { %2296 = vmatprep.subr.bf16.mxu0 %v2894_v0  ;;  %2316 = vmatprep.subr.bf16.mxu1 %v2894_v0 }
  0xb2   :  { %2297 = vmatpush3.bf16.msra.mxu0 %v2466_v15  ;;  %2317 = vmatpush3.bf16.msra.mxu1 %v2467_v16  ;;  %v174_v15 = vcombine.high %v166_v62, %v166_v62 }
  0xb3   :  { %2322 = vmatprep.subr.bf16.mxu0 %v2894_v0  ;;  %672 = vmatprep.subr.bf16.mxu1 %v2478_v28  ;;  %v2513_v28 = vld [vmem:[#allocation14 + $0x28] sm:$0xff]  }
  0xb4   :  { %v237_v16 = vrot.slane %v174_v15, %v3131_v63 }
  0xb5   :  { %2299 = vmatmul.mubr.bf16.vlgmr.msra.gmra.mrb[0].mxu0 %v175_v17  ;;  %2319 = vmatmul.mubr.bf16.vlgmr.msra.gmra.mrb[0].mxu1 %v176_v19 }
  0xb6   :  { %2323 = vmatpush3.bf16.msra.mxu0 %v2468_v18  ;;  %2338 = vmatprep.mubr.msk.bf16.mxu0 %vm2895_vm0, %v2894_v0 }
  0xb7   :  { %2324 = vmatprep.subr.bf16.mxu0 %v2894_v0  ;;  %673 = vmatpush1.bf16.msra.mxu1 %v2476_v29  ;;  %v2514_v29 = vld [vmem:[#allocation14 + $0x30] sm:$0xff]  }
  0xb8   :  { %674 = vmatprep.subr.bf16.mxu1 %v2482_v32  ;;  %704 = vmatprep.mubr.bf16.mxu1 %v2896_v52  ;;  %v764_v32 = vsub.s32 4, %v3121_v57 }
  0xba   :  { %2325 = vmatpush3.bf16.msra.mxu0 %v2469_v20 }
  0xbb   :  { %2326 = vmatprep.subr.bf16.mxu0 %v2894_v0  ;;  %675 = vmatpush1.bf16.msra.mxu1 %v2480_v31  ;;  %v3156_v31 = vsub.s32 3, %v3121_v57 }
  0xbc   :  { %676 = vmatprep.subr.bf16.mxu1 %v2486_v34  ;;  %v765_v34 = vrot.slane %v3127_v59, %v764_v32 }
  0xbe   :  { %2327 = vmatpush3.bf16.msra.mxu0 %v2470_v21  ;;  %v2508_v21 = vld [vmem:[#allocation14] sm:$0xff]  }
  0xbf   :  { %2328 = vmatprep.subr.bf16.mxu0 %v2894_v0  ;;  %677 = vmatpush1.bf16.msra.mxu1 %v2484_v35 }
  0xc0   :  { %678 = vmatprep.subr.bf16.mxu1 %v2490_v37 }
  0xc2   :  { %2329 = vmatpush3.bf16.msra.mxu0 %v2471_v22 }
  0xc3   :  { %2330 = vmatprep.subr.bf16.mxu0 %v2894_v0  ;;  %679 = vmatpush1.bf16.msra.mxu1 %v2488_v38 }
  0xc4   :  { %680 = vmatprep.subr.bf16.mxu1 %v2494_v40 }
  0xc6   :  { %2331 = vmatpush3.bf16.msra.mxu0 %v2472_v23 }
  0xc7   :  { %2332 = vmatprep.subr.bf16.mxu0 %v2894_v0  ;;  %681 = vmatpush1.bf16.msra.mxu1 %v2492_v41 }
  0xc8   :  { %682 = vmatprep.subr.bf16.mxu1 %v2498_v43 }
  0xca   :  { %2333 = vmatpush3.bf16.msra.mxu0 %v2473_v24  ;;  %v2509_v24 = vld [vmem:[#allocation14 + $0x8] sm:$0xff]  }
  0xcb   :  { %2334 = vmatprep.subr.bf16.mxu0 %v2894_v0  ;;  %683 = vmatpush1.bf16.msra.mxu1 %v2496_v44 }
  0xcc   :  { %684 = vmatprep.subr.bf16.mxu1 %v2502_v46 }
  0xce   :  { %2335 = vmatpush3.bf16.msra.mxu0 %v2474_v25  ;;  %v2510_v25 = vld [vmem:[#allocation14 + $0x10] sm:$0xff]  }
  0xcf   :  { %2336 = vmatprep.subr.bf16.mxu0 %v2894_v0  ;;  %685 = vmatpush1.bf16.msra.mxu1 %v2500_v47 }
  0xd0   :  { %686 = vmatprep.subr.bf16.mxu1 %v2506_v49 }
  0xd2   :  { %2337 = vmatpush3.bf16.msra.mxu0 %v2475_v26  ;;  %v2511_v26 = vld [vmem:[#allocation14 + $0x18] sm:$0xff]  }
  0xd3   :  { %2342 = vmatprep.subr.bf16.mxu0 %v2894_v0  ;;  %687 = vmatpush1.bf16.msra.mxu1 %v2504_v50 }
  0xd4   :  { %2362 = vmatprep.subr.bf16.mxu1 %v2894_v0 }
  0xd5   :  { %2339 = vmatmul.mubr.bf16.vlgmr.msra.gmra.mrb[4].mxu0 %v177_v27  ;;  %v2512_v27 = vld [vmem:[#allocation14 + $0x20] sm:$0xff]  }
  0xd6   :  { %2358 = vmatprep.mubr.msk.bf16.mxu0 %vm2895_vm0, %v2894_v0  ;;  %2343 = vmatpush3.bf16.msra.mxu0 %v2479_v30  ;;  %v2515_v30 = vld [vmem:[#allocation14 + $0x38] sm:$0xff]  }
  0xd7   :  { %2344 = vmatprep.subr.bf16.mxu0 %v2894_v0 }
  0xda   :  { %2345 = vmatpush3.bf16.msra.mxu0 %v2483_v33  ;;  %v759_v33 = vrot.slane %v3127_v59, %v3156_v31 }
  0xdb   :  { %2346 = vmatprep.subr.bf16.mxu0 %v2894_v0 }
  0xde   :  { %2347 = vmatpush3.bf16.msra.mxu0 %v2487_v36 }
  0xdf   :  { %2348 = vmatprep.subr.bf16.mxu0 %v2894_v0 }
  0xe2   :  { %2349 = vmatpush3.bf16.msra.mxu0 %v2491_v39 }
  0xe3   :  { %2350 = vmatprep.subr.bf16.mxu0 %v2894_v0 }
  0xe6   :  { %2351 = vmatpush3.bf16.msra.mxu0 %v2495_v42 }
  0xe7   :  { %2352 = vmatprep.subr.bf16.mxu0 %v2894_v0 }
  0xea   :  { %2353 = vmatpush3.bf16.msra.mxu0 %v2499_v45 }
  0xeb   :  { %2354 = vmatprep.subr.bf16.mxu0 %v2894_v0 }
  0xee   :  { %2355 = vmatpush3.bf16.msra.mxu0 %v2503_v48 }
  0xef   :  { %2356 = vmatprep.subr.bf16.mxu0 %v2894_v0 }
  0xf2   :  { %2357 = vmatpush3.bf16.msra.mxu0 %v2507_v51 }
  0xf3   :  { %2390 = vmatprep.subr.bf16.mxu0 %v2894_v0 }
 0x188   :  { %v323_v4 = vpop.f32.mrb[0].mxu0  ;;  %v411_v7 = vpop.f32.mrb[0].mxu1 }
 0x189   :  { %v324_v5 = vadd.f32 %v323_v4, %v229_v2  ;;  %v2300_v6 = vpop.f32.mrb[1].mxu0  ;;  %v412_v8 = vadd.f32 %v411_v7, %v233_v3  ;;  %v2320_v10 = vpop.f32.mrb[1].mxu1  ;;  %v2517_v7 = vld [vmem:[#allocation8 + $0x8] sm:$0xff]  }
 0x18a   :  { %v326_v9 = vpop.f32.mrb[2].mxu0  ;;  %v414_v12 = vpop.f32.mrb[2].mxu1  ;;  %v2516_v6 = vld [vmem:[#allocation8] sm:$0xff]  }
 0x18b   :  { %v2301_v11 = vpop.f32.mrb[3].mxu0  ;;  %v3135_v13 = vcombine.low %v324_v5, %v412_v8  ;;  %v2321_v14 = vpop.f32.mrb[3].mxu1  ;;  %v2518_v8 = vld [vmem:[#allocation8 + $0x10] sm:$0xff]   ;;  %v2519_v9 = vld [vmem:[#allocation8 + $0x18] sm:$0xff]   ;;  %v2520_v10 = vld [vmem:[#allocation8 + $0x20] sm:$0xff]  }
 0x18c   :  { %v2521_v11 = vld [vmem:[#allocation8 + $0x28] sm:$0xff]   ;;  %v2522_v12 = vld [vmem:[#allocation8 + $0x30] sm:$0xff]   ;;  %v2523_v14 = vld [vmem:[#allocation8 + $0x38] sm:$0xff]  }
 0x18d   :  { %509 = vst [vmem:[#allocation16] sm:$0xff] %v3135_v13 }
 0x1a8   :  { %v499_v17 = vpop.f32.mrb[4].mxu0 }
 0x1a9   :  { %v3139_v18 = vadd.f32 %v499_v17, %v237_v16  ;;  %v2340_v19 = vpop.f32.mrb[5].mxu0 }
 0x1aa   :  { %v502_v20 = vpop.f32.mrb[6].mxu0 }
 0x1ab   :  { %v511_v22 = vpack.c.bf16 %v3139_v18, %v3135_v13  ;;  %510 = vst [vmem:[#allocation16 + $0x8] sm:$0xf] %v3139_v18  ;;  %v2341_v23 = vpop.f32.mrb[7].mxu0 }
 0x1ad   :  { %705 = vmatmul.mubr.bf16.vlgmr.msra.gmra.mrb[4].mxu1 %v511_v22  ;;  %2359 = vmatmul.mubr.bf16.vlgmr.msra.gmra.mrb[8].mxu0 %v511_v22 }
 0x1ae   :  { %2363 = vmatpush3.bf16.msra.mxu1 %v2508_v21  ;;  %2378 = vmatprep.mubr.msk.bf16.mxu1 %vm2895_vm0, %v2894_v0 }
 0x1af   :  { %2364 = vmatprep.subr.bf16.mxu1 %v2894_v0  ;;  %2406 = vmatprep.mubr.msk.bf16.mxu0 %vm2895_vm0, %v2894_v0 }
 0x1b0   :  { %2391 = vmatpush3.bf16.msra.mxu0 %v2516_v6 }
 0x1b1   :  { %2392 = vmatprep.subr.bf16.mxu0 %v2894_v0 }
 0x1b2   :  { %2365 = vmatpush3.bf16.msra.mxu1 %v2509_v24 }
 0x1b3   :  { %2366 = vmatprep.subr.bf16.mxu1 %v2894_v0 }
 0x1b4   :  { %2393 = vmatpush3.bf16.msra.mxu0 %v2517_v7 }
 0x1b5   :  { %2394 = vmatprep.subr.bf16.mxu0 %v2894_v0 }
 0x1b6   :  { %2367 = vmatpush3.bf16.msra.mxu1 %v2510_v25 }
 0x1b7   :  { %2368 = vmatprep.subr.bf16.mxu1 %v2894_v0 }
 0x1b8   :  { %2395 = vmatpush3.bf16.msra.mxu0 %v2518_v8 }
 0x1b9   :  { %2396 = vmatprep.subr.bf16.mxu0 %v2894_v0 }
 0x1ba   :  { %2369 = vmatpush3.bf16.msra.mxu1 %v2511_v26 }
 0x1bb   :  { %2370 = vmatprep.subr.bf16.mxu1 %v2894_v0 }
 0x1bc   :  { %2397 = vmatpush3.bf16.msra.mxu0 %v2519_v9 }
 0x1bd   :  { %2398 = vmatprep.subr.bf16.mxu0 %v2894_v0 }
 0x1be   :  { %2371 = vmatpush3.bf16.msra.mxu1 %v2512_v27 }
 0x1bf   :  { %2372 = vmatprep.subr.bf16.mxu1 %v2894_v0 }
 0x1c0   :  { %2399 = vmatpush3.bf16.msra.mxu0 %v2520_v10 }
 0x1c1   :  { %2400 = vmatprep.subr.bf16.mxu0 %v2894_v0 }
 0x1c2   :  { %2373 = vmatpush3.bf16.msra.mxu1 %v2513_v28 }
 0x1c3   :  { %2374 = vmatprep.subr.bf16.mxu1 %v2894_v0 }
 0x1c4   :  { %2401 = vmatpush3.bf16.msra.mxu0 %v2521_v11 }
 0x1c5   :  { %2402 = vmatprep.subr.bf16.mxu0 %v2894_v0 }
 0x1c6   :  { %2375 = vmatpush3.bf16.msra.mxu1 %v2514_v29 }
 0x1c7   :  { %2376 = vmatprep.subr.bf16.mxu1 %v2894_v0 }
 0x1c8   :  { %2403 = vmatpush3.bf16.msra.mxu0 %v2522_v12 }
 0x1c9   :  { %2404 = vmatprep.subr.bf16.mxu0 %v2894_v0 }
 0x1ca   :  { %2377 = vmatpush3.bf16.msra.mxu1 %v2515_v30 }
 0x1cc   :  { %2405 = vmatpush3.bf16.msra.mxu0 %v2523_v14 }
 0x280   :  { %v706_v35 = vpop.f32.mrb[4].mxu1  ;;  %v3164_v36 = vpop.f32.mrb[8].mxu0 }
 0x281   :  { %v760_v37 = vadd.f32 %v759_v33, %v706_v35  ;;  %v708_v38 = vpop.f32.mrb[5].mxu1  ;;  %v2360_v39 = vpop.f32.mrb[9].mxu0 }
 0x282   :  { %v766_v40 = vadd.f32 %v765_v34, %v708_v38  ;;  %v710_v41 = vpop.f32.mrb[6].mxu1  ;;  %v3166_v42 = vpop.f32.mrb[10].mxu0 }
 0x283   :  { %v775_v43 = vcombine.high %v760_v37, %v760_v37  ;;  %v761_v44 = vadd.f32 %v759_v33, %v710_v41  ;;  %v712_v45 = vpop.f32.mrb[7].mxu1  ;;  %v2361_v46 = vpop.f32.mrb[11].mxu0 }
 0x284   :  { %v778_v47 = vcombine.high %v766_v40, %v766_v40  ;;  %v780_v48 = vmul.f32 %v766_v40, %v760_v37  ;;  %v767_v49 = vadd.f32 %v765_v34, %v712_v45 }
 0x285   :  { %v783_v50 = vmul.f32 %v775_v43, %v766_v40  ;;  %v786_v51 = vmul.f32 %v766_v40, %v761_v44 }
 0x286   :  { %v787_v53 = vmul.f32 %v778_v47, %v761_v44  ;;  %v782_v54 = vmul.f32 %v767_v49, %v760_v37  ;;  %v785_v55 = vmul.f32 %v775_v43, %v767_v49  ;;  %v781_v56 = vmul.f32 %v778_v47, %v760_v37 }
 0x287   :  { %v784_v58 = vmul.f32 %v778_v47, %v775_v43  ;;  %v788_v60 = vmul.f32 %v767_v49, %v761_v44 }
 0x288   :  { %v798_v61 = vcombine.low %v782_v54, %v783_v50  ;;  %v797_v62 = vcombine.low %v780_v48, %v781_v56  ;;  %v800_v1 = vcombine.low %v786_v51, %v787_v53 }
 0x289   :  { %v799_v2 = vcombine.low %v784_v58, %v785_v55  ;;  %v807_v5 = vpack.c.bf16 %v788_v60, %v788_v60 }
 0x28a   :  { %v805_v3 = vpack.c.bf16 %v798_v61, %v797_v62 }
 0x28b   :  { %v806_v4 = vpack.c.bf16 %v800_v1, %v799_v2 }
 0x28c   :  { %2379 = vmatmul.mubr.bf16.vlgmr.msra.gmra.mrb[8].mxu1 %v805_v3 }
 0x28d   :  { %2382 = vmatprep.mubr.msk.bf16.mxu1 %vm2895_vm0, %v2894_v0 }
 0x294   :  { %2383 = vmatmul.mubr.bf16.gmra.mrb[12].mxu1 %v806_v4 }
 0x295   :  { %2386 = vmatprep.mubr.msk.bf16.mxu1 %vm2895_vm0, %v2894_v0 }
 0x29c   :  { %2387 = vmatmul.mubr.bf16.gmra.mrb[16].mxu1 %v807_v5 }
 0x29d   :  { %1437 = vmatprep.mubr.bf16.mxu1 %v2896_v52 }
 0x35f   :  { %v906_v15 = vpop.f32.mrb[8].mxu1 }
 0x360   :  { %v932_v16 = vcombine.high %v906_v15, %v906_v15  ;;  %v2380_v17 = vpop.f32.mrb[9].mxu1  ;;  %v941_v20 = vsel %vm940_vm1, %v906_v15, -inf }
 0x361   :  { %v909_v19 = vpop.f32.mrb[10].mxu1 }
 0x362   :  { %v943_v21 = vsel %vm940_vm1, %v909_v19, -inf  ;;  %v2381_v22 = vpop.f32.mrb[11].mxu1  ;;  %v942_v24 = vsel %vm940_vm1, %v932_v16, -inf  ;;  %v933_v26 = vcombine.high %v909_v19, %v909_v19 }
 0x363   :  { %v944_v23 = vmax.f32 %v941_v20, %v943_v21 }
 0x364   :  { %v946_v39 = vsel %vm940_vm1, %v933_v26, -inf }
 0x365   :  { %v945_v25 = vmax.f32 %v944_v23, %v942_v24 }
 0x367   :  { %v956_v27 = vsub.f32 %v906_v15, %v945_v25  ;;  %v957_v28 = vsub.f32 %v932_v16, %v945_v25  ;;  %v958_v29 = vsub.f32 %v909_v19, %v945_v25  ;;  %v914_v30 = vpop.f32.mrb[12].mxu1  ;;  %v770_v19 = vsub.s32 5, %v3121_v57 }
 0x368   :  { %v934_v33 = vcombine.high %v914_v30, %v914_v30  ;;  %v2384_v34 = vpop.f32.mrb[13].mxu1  ;;  %v947_v45 = vsel %vm940_vm1, %v914_v30, -inf }
 0x369   :  { %v965_v35 = vmul.f32 1.442695, %v956_v27  ;;  %v967_v37 = vmul.f32 1.442695, %v957_v28  ;;  %v969_v38 = vmul.f32 1.442695, %v958_v29  ;;  %v771_v23 = vrot.slane %v3127_v59, %v770_v19 }
 0x36a   :  { %v948_v40 = vsel %vm940_vm1, %v934_v33, -inf  ;;  %v917_v41 = vpop.f32.mrb[14].mxu1 }
 0x36b   :  { %2612 = vpow2.f32 %v965_v35  ;;  %v949_v43 = vmax.f32 %v946_v39, %v948_v40  ;;  %v2385_v44 = vpop.f32.mrb[15].mxu1  ;;  %v935_v47 = vcombine.high %v917_v41, %v917_v41  ;;  %v951_v53 = vsel %vm940_vm1, %v917_v41, -inf }
 0x36c   :  { %2614 = vpow2.f32 %v967_v37  ;;  %v772_v29 = vadd.f32 %v771_v23, %v3164_v36 }
 0x36d   :  { %2616 = vpow2.f32 %v969_v38  ;;  %v950_v46 = vmax.f32 %v949_v43, %v947_v45  ;;  %v952_v62 = vsel %vm940_vm1, %v935_v47, -inf }
 0x36e   :  { %v1011_v40 = vcombine.high %v772_v29, %v772_v29 }
 0x36f   :  { %v959_v48 = vsub.f32 %v933_v26, %v950_v46  ;;  %v960_v49 = vsub.f32 %v914_v30, %v950_v46  ;;  %v961_v50 = vsub.f32 %v934_v33, %v950_v46  ;;  %v922_v51 = vpop.f32.mrb[16].mxu1 }
 0x370   :  { %v953_v54 = vsel %vm940_vm1, %v922_v51, -inf  ;;  %v2388_v55 = vpop.f32.mrb[17].mxu1 }
 0x371   :  { %v971_v56 = vmul.f32 1.442695, %v959_v48  ;;  %v973_v58 = vmul.f32 1.442695, %v960_v49  ;;  %v975_v60 = vmul.f32 1.442695, %v961_v50  ;;  %v954_v61 = vmax.f32 %v951_v53, %v953_v54 }
 0x372   :  { %v925_v1 = vpop.f32.mrb[18].mxu1 }
 0x373   :  { %2618 = vpow2.f32 %v971_v56  ;;  %v955_v2 = vmax.f32 %v954_v61, %v952_v62  ;;  %v2389_v3 = vpop.f32.mrb[19].mxu1 }
 0x374   :  { %2620 = vpow2.f32 %v973_v58 }
 0x375   :  { %v2613_v4 = vpop.eup %2612  ;;  %2622 = vpow2.f32 %v975_v60  ;;  %v962_v5 = vsub.f32 %v917_v41, %v955_v2  ;;  %v963_v6 = vsub.f32 %v935_v47, %v955_v2  ;;  %v964_v7 = vsub.f32 %v922_v51, %v955_v2 }
 0x376   :  { %v2615_v8 = vpop.eup %2614  ;;  %v983_v9 = vsel %vm940_vm1, %v2613_v4, 0.0  ;;  %v773_v41 = vadd.f32 %v771_v23, %v3166_v42 }
 0x377   :  { %v2617_v10 = vpop.eup %2616  ;;  %v984_v11 = vsel %vm940_vm1, %v2615_v8, 0.0  ;;  %v977_v12 = vmul.f32 1.442695, %v962_v5  ;;  %v979_v14 = vmul.f32 1.442695, %v963_v6 }
 0x378   :  { %v985_v15 = vadd.f32 %v984_v11, %v983_v9  ;;  %v981_v16 = vmul.f32 1.442695, %v964_v7  ;;  %v986_v17 = vsel %vm940_vm1, %v2617_v10, 0.0 }
 0x379   :  { %2624 = vpow2.f32 %v977_v12 }
 0x37a   :  { %v987_v20 = vadd.f32 %v986_v17, %v985_v15  ;;  %2626 = vpow2.f32 %v979_v14 }
 0x37b   :  { %2628 = vpow2.f32 %v981_v16 }
 0x37c   :  { %2630 = vrcp.f32 %v987_v20 }
 0x37d   :  { %v2619_v21 = vpop.eup %2618 }
 0x37e   :  { %v2621_v22 = vpop.eup %2620  ;;  %v988_v24 = vsel %vm940_vm1, %v2619_v21, 0.0 }
 0x37f   :  { %v2623_v25 = vpop.eup %2622  ;;  %v989_v26 = vsel %vm940_vm1, %v2621_v22, 0.0 }
 0x380   :  { %v990_v27 = vadd.f32 %v989_v26, %v988_v24  ;;  %v991_v28 = vsel %vm940_vm1, %v2623_v25, 0.0  ;;  %v1060_v24 = vsub.s32 6, %v3121_v57 }
 0x382   :  { %v992_v30 = vadd.f32 %v991_v28, %v990_v27  ;;  %v1061_v26 = vrot.slane %v3127_v59, %v1060_v24 }
 0x383   :  { %v2625_v33 = vpop.eup %2624 }
 0x384   :  { %v2627_v34 = vpop.eup %2626  ;;  %2632 = vrcp.f32 %v992_v30  ;;  %v993_v35 = vsel %vm940_vm1, %v2625_v33, 0.0 }
 0x385   :  { %v2629_v37 = vpop.eup %2628  ;;  %v994_v38 = vsel %vm940_vm1, %v2627_v34, 0.0 }
 0x386   :  { %v2631_v39 = vpop.eup %2630  ;;  %v995_v43 = vadd.f32 %v994_v38, %v993_v35  ;;  %v996_v45 = vsel %vm940_vm1, %v2629_v37, 0.0  ;;  %v2524_v38 = vld [vmem:[#allocation10] ss:$16 sps:$4 sm:$0xff]  }
 0x387   :  { %v1003_v44 = vmul.f32 %v2631_v39, %v2617_v10  ;;  %v1001_v46 = vmul.f32 %v2631_v39, %v2613_v4  ;;  %v1002_v47 = vmul.f32 %v2631_v39, %v2615_v8  ;;  %v2527_v39 = vld [vmem:[#allocation10 + $0x8] ss:$16 sps:$4 sm:$0xff]  }
 0x388   :  { %v997_v36 = vadd.f32 %v996_v45, %v995_v43  ;;  %v2535_v43 = vld [vmem:[#allocation10 + $0x2c] ss:$16 sps:$4 sm:$0xff]  }
 0x389   :  { %v1013_v48 = vmul.f32 %v1001_v46, %v772_v29  ;;  %v1014_v49 = vmul.f32 %v1011_v40, %v1002_v47  ;;  %v1015_v50 = vmul.f32 %v1003_v44, %v773_v41  ;;  %v2530_v44 = vld [vmem:[#allocation10 + $0x20] ss:$16 sps:$4 sm:$0xff]  }
 0x38a   :  { %2634 = vrcp.f32 %v997_v36 }
 0x38b   :  { %v1022_v51 = vsel %vm940_vm1, %v1013_v48, 0.0  ;;  %v1023_v53 = vsel %vm940_vm1, %v1014_v49, 0.0  ;;  %v1025_v55 = vsel %vm940_vm1, %v1015_v50, 0.0 }
 0x38c   :  { %v1024_v54 = vadd.f32 %v1023_v53, %v1022_v51  ;;  %v2538_v53 = vld [vmem:[#allocation10 + $0x44] ss:$16 sps:$4 sm:$0xff]  }
 0x38e   :  { %v2633_v56 = vpop.eup %2632  ;;  %v1026_v42 = vadd.f32 %v1025_v55, %v1024_v54  ;;  %v2541_v54 = vld [vmem:[#allocation10 + $0x4c] ss:$16 sps:$4 sm:$0xff]   ;;  %v2536_v55 = vld [vmem:[#allocation10 + $0x40] ss:$16 sps:$4 sm:$0xff]  }
 0x38f   :  { %v1005_v58 = vmul.f32 %v2633_v56, %v2621_v22  ;;  %v1004_v60 = vmul.f32 %v2633_v56, %v2619_v21  ;;  %v1006_v61 = vmul.f32 %v2633_v56, %v2623_v25  ;;  %v2539_v56 = vld [vmem:[#allocation10 + $0x48] ss:$16 sps:$4 sm:$0xff]  }
 0x391   :  { %v1016_v62 = vmul.f32 %v1004_v60, %v772_v29  ;;  %v1017_v1 = vmul.f32 %v1011_v40, %v1005_v58  ;;  %v1018_v2 = vmul.f32 %v1006_v61, %v773_v41  ;;  %v2547_v58 = vld [vmem:[#allocation10 + $0x6c] ss:$16 sps:$4 sm:$0xff]   ;;  %v2542_v60 = vld [vmem:[#allocation10 + $0x60] ss:$16 sps:$4 sm:$0xff]   ;;  %v2545_v61 = vld [vmem:[#allocation10 + $0x68] ss:$16 sps:$4 sm:$0xff]  }
 0x393   :  { %v1027_v3 = vsel %vm940_vm1, %v1016_v62, 0.0  ;;  %v1028_v4 = vsel %vm940_vm1, %v1017_v1, 0.0  ;;  %v1030_v10 = vsel %vm940_vm1, %v1018_v2, 0.0  ;;  %v2550_v62 = vld [vmem:[#allocation10 + $0x84] ss:$16 sps:$4 sm:$0xff]  }
 0x394   :  { %v2635_v5 = vpop.eup %2634  ;;  %v1029_v6 = vadd.f32 %v1028_v4, %v1027_v3  ;;  %v2553_v1 = vld [vmem:[#allocation10 + $0x8c] ss:$16 sps:$4 sm:$0xff]   ;;  %v2548_v2 = vld [vmem:[#allocation10 + $0x80] ss:$16 sps:$4 sm:$0xff]   ;;  %v2551_v3 = vld [vmem:[#allocation10 + $0x88] ss:$16 sps:$4 sm:$0xff]  }
 0x395   :  { %v1009_v7 = vmul.f32 %v2635_v5, %v2629_v37  ;;  %v1007_v8 = vmul.f32 %v2635_v5, %v2625_v33  ;;  %v1008_v9 = vmul.f32 %v2635_v5, %v2627_v34  ;;  %v2556_v4 = vld [vmem:[#allocation10 + $0xa4] ss:$16 sps:$4 sm:$0xff]   ;;  %v2559_v5 = vld [vmem:[#allocation10 + $0xac] ss:$16 sps:$4 sm:$0xff]  }
 0x396   :  { %v1031_v11 = vadd.f32 %v1030_v10, %v1029_v6  ;;  %v2554_v6 = vld [vmem:[#allocation10 + $0xa0] ss:$16 sps:$4 sm:$0xff]  }
 0x397   :  { %v1019_v12 = vmul.f32 %v1007_v8, %v772_v29  ;;  %v1020_v14 = vmul.f32 %v1011_v40, %v1008_v9  ;;  %v1021_v15 = vmul.f32 %v1009_v7, %v773_v41  ;;  %v2529_v40 = vld [vmem:[#allocation10 + $0xc] ss:$16 sps:$4 sm:$0xff]   ;;  %v2532_v41 = vld [vmem:[#allocation10 + $0x24] ss:$16 sps:$4 sm:$0xff]   ;;  %v2557_v7 = vld [vmem:[#allocation10 + $0xa8] ss:$16 sps:$4 sm:$0xff]  }
 0x398   :  { %v1039_v16 = vcombine.low %v1026_v42, %v1031_v11  ;;  %1448 = vmatprep.subr.bf16.mxu0 %v2529_v40  ;;  %v2544_v42 = vld [vmem:[#allocation10 + $0x64] ss:$16 sps:$4 sm:$0xff]   ;;  %v2565_v9 = vld [vmem:[#allocation10 + $0xcc] ss:$16 sps:$4 sm:$0xff]   ;;  %v2560_v10 = vld [vmem:[#allocation10 + $0xc0] ss:$16 sps:$4 sm:$0xff]  }
 0x399   :  { %v1032_v17 = vsel %vm940_vm1, %v1019_v12, 0.0  ;;  %v1033_v19 = vsel %vm940_vm1, %v1020_v14, 0.0  ;;  %v1035_v21 = vsel %vm940_vm1, %v1021_v15, 0.0  ;;  %v2562_v8 = vld [vmem:[#allocation10 + $0xc4] ss:$16 sps:$4 sm:$0xff]  }
 0x39a   :  { %v1034_v20 = vadd.f32 %v1033_v19, %v1032_v17  ;;  %v2563_v11 = vld [vmem:[#allocation10 + $0xc8] ss:$16 sps:$4 sm:$0xff]   ;;  %v2566_v12 = vld [vmem:[#allocation10 + $0xe0] ss:$16 sps:$4 sm:$0xff]   ;;  %v2568_v14 = vld [vmem:[#allocation10 + $0xe4] ss:$16 sps:$4 sm:$0xff]  }
 0x39b   :  { %v2569_v15 = vld [vmem:[#allocation10 + $0xe8] ss:$16 sps:$4 sm:$0xff]   ;;  %v2572_v17 = vld [vmem:[#allocation11 + $0x40] sm:$0xff]  }
 0x39c   :  { %v1036_v22 = vadd.f32 %v1035_v21, %v1034_v20  ;;  %v2573_v19 = vld [vmem:[#allocation11 + $0xc0] sm:$0xff]  }
 0x39d   :  { %v2575_v40 = vld [vmem:[#allocation11 + $0x80] sm:$0xff]  }
 0x39e   :  { %v1041_v23 = vpack.c.bf16 %v1036_v22, %v1039_v16  ;;  %v2571_v16 = vld [vmem:[#allocation10 + $0xec] ss:$16 sps:$4 sm:$0xff]  }
 0x3a0   :  { %2407 = vmatmul.mubr.bf16.vlgmr.msra.gmra.mrb[12].mxu0 %v1041_v23 }
 0x3a1   :  { %1480 = vmatprep.mubr.bf16.mxu0 %v2896_v52  ;;  %v2526_v52 = vld [vmem:[#allocation10 + $0x4] ss:$16 sps:$4 sm:$0xff]   ;;  %1449 = vmatpush1.bf16.msra.mxu0 %v2527_v39 }
 0x3a2   :  { %1405 = vmatprep.subr.bf16.mxu1 %v2526_v52  ;;  %1450 = vmatprep.subr.bf16.mxu0 %v2535_v43  ;;  %v2576_v43 = vld [vmem:[#allocation11 + $0x48] sm:$0xff]  }
 0x3a3   :  { %1406 = vmatpush1.bf16.msra.mxu1 %v2524_v38 }
 0x3a4   :  { %1407 = vmatprep.subr.bf16.mxu1 %v2532_v41 }
 0x3a7   :  { %1408 = vmatpush1.bf16.msra.mxu1 %v2530_v44  ;;  %v2577_v44 = vld [vmem:[#allocation11 + $0xc8] sm:$0xff]  }
 0x3a8   :  { %1409 = vmatprep.subr.bf16.mxu1 %v2538_v53  ;;  %v2588_v53 = vld [vmem:[#allocation11 + $0x60] sm:$0xff]  }
 0x3ab   :  { %1410 = vmatpush1.bf16.msra.mxu1 %v2536_v55  ;;  %v2590_v55 = vld [vmem:[#allocation11 + $0x20] sm:$0xff]  }
 0x3ac   :  { %1411 = vmatprep.subr.bf16.mxu1 %v2544_v42  ;;  %v2592_v42 = vld [vmem:[#allocation11 + $0x68] sm:$0xff]  }
 0x3af   :  { %1412 = vmatpush1.bf16.msra.mxu1 %v2542_v60  ;;  %v2594_v60 = vld [vmem:[#allocation11 + $0x28] sm:$0xff]  }
 0x3b0   :  { %1413 = vmatprep.subr.bf16.mxu1 %v2550_v62  ;;  %v2596_v62 = vld [vmem:[#allocation11 + $0x70] sm:$0xff]  }
 0x3b3   :  { %1414 = vmatpush1.bf16.msra.mxu1 %v2548_v2  ;;  %v2598_v2 = vld [vmem:[#allocation11 + $0x30] sm:$0xff]  }
 0x3b4   :  { %1415 = vmatprep.subr.bf16.mxu1 %v2556_v4  ;;  %v2600_v4 = vld [vmem:[#allocation11 + $0x78] sm:$0xff]  }
 0x3b7   :  { %1416 = vmatpush1.bf16.msra.mxu1 %v2554_v6  ;;  %v2602_v6 = vld [vmem:[#allocation11 + $0x38] sm:$0xff]  }
 0x3b8   :  { %1417 = vmatprep.subr.bf16.mxu1 %v2562_v8  ;;  %v1235_v8 = vsub.s32 2, %v3121_v57 }
 0x3bb   :  { %1418 = vmatpush1.bf16.msra.mxu1 %v2560_v10  ;;  %v1231_v10 = vsub.s32 1, %v3121_v57 }
 0x3bc   :  { %1419 = vmatprep.subr.bf16.mxu1 %v2568_v14 }
 0x3bf   :  { %1420 = vmatpush1.bf16.msra.mxu1 %v2566_v12 }
 0x3c0   :  { %2229 = vmatprep.subr.bf16.mxu1 %v2572_v17 }
 0x473   :  { %v1144_v25 = vpop.f32.mrb[12].mxu0 }
 0x474   :  { %v2408_v27 = vpop.f32.mrb[13].mxu0  ;;  %v1145_v34 = vadd.f32 %v1144_v25, %v1061_v26 }
 0x475   :  { %v1147_v28 = vpop.f32.mrb[14].mxu0 }
 0x476   :  { %v1148_v29 = vadd.f32 %v1147_v28, %v1061_v26  ;;  %v2409_v30 = vpop.f32.mrb[15].mxu0  ;;  %v1151_v37 = vadd.f32 %v1145_v34, %v3135_v13  ;;  %v1180_v26 = vsub.s32 7, %v3121_v57 }
 0x477   :  { %v3232_v30 = vld [vmem:[%s3315_s9 + $0x8] sm:$0x1f] }
 0x478   :  { %v1152_v33 = vadd.f32 %v1148_v29, %v3139_v18  ;;  %v2533_v18 = vld [vmem:[#allocation10 + $0x28] ss:$16 sps:$4 sm:$0xff]   ;;  %v1181_v28 = vrot.slane %v3127_v59, %v1180_v26  ;;  %v2574_v59 = vld [vmem:[#allocation11] sm:$0xff]  }
 0x479   :  { %1451 = vmatpush1.bf16.msra.mxu0 %v2533_v18  ;;  %v2578_v18 = vld [vmem:[#allocation11 + $0x8] sm:$0xff]  }
 0x47a   :  { %v1155_v35 = vsel %vm940_vm1, %v1152_v33, 0.0  ;;  %1452 = vmatprep.subr.bf16.mxu0 %v2541_v54  ;;  %v2589_v54 = vld [vmem:[#allocation11 + $0xe0] sm:$0xff]  }
 0x47b   :  { %1156 = vadd.xlane.f32.xlu0 %v1155_v35 }
 0x47d   :  { %1453 = vmatpush1.bf16.msra.mxu0 %v2539_v56  ;;  %v2591_v56 = vld [vmem:[#allocation11 + $0xa0] sm:$0xff]  }
 0x47e   :  { %1454 = vmatprep.subr.bf16.mxu0 %v2547_v58  ;;  %v2593_v58 = vld [vmem:[#allocation11 + $0xe8] sm:$0xff]  }
 0x47f   :  { %1153 = vadd.xlane.f32.xlu0 %v1151_v37 }
 0x481   :  { %1455 = vmatpush1.bf16.msra.mxu0 %v2545_v61  ;;  %v2595_v61 = vld [vmem:[#allocation11 + $0xa8] sm:$0xff]  }
 0x482   :  { %1456 = vmatprep.subr.bf16.mxu0 %v2553_v1  ;;  %v2597_v1 = vld [vmem:[#allocation11 + $0xf0] sm:$0xff]  }
 0x485   :  { %1457 = vmatpush1.bf16.msra.mxu0 %v2551_v3  ;;  %v2599_v3 = vld [vmem:[#allocation11 + $0xb0] sm:$0xff]  }
 0x486   :  { %1458 = vmatprep.subr.bf16.mxu0 %v2559_v5  ;;  %v2601_v5 = vld [vmem:[#allocation11 + $0xf8] sm:$0xff]  }
 0x489   :  { %1459 = vmatpush1.bf16.msra.mxu0 %v2557_v7  ;;  %v2603_v7 = vld [vmem:[#allocation11 + $0xb8] sm:$0xff]  }
 0x48a   :  { %1460 = vmatprep.subr.bf16.mxu0 %v2565_v9  ;;  %v1223_v9 = vld [vmem:[%s3311_s5] sm:$0xf]  ;;  %s2898_s5 = smov [#allocation16]  }
 0x48b   :  { %v1236_v12 = vrot.slane %v1223_v9, %v1235_v8  ;;  %v1232_v14 = vrot.slane %v1223_v9, %v1231_v10  ;;  %s2010_s22 = sshll.u32 %s2898_s5, 4  ;;  %s2011_s22 = int_to_ptr.vmem [resolvable:$true] %s2010_s22 }
 0x48c   :  { %s2820_s23 = scalar_lea.vmem %s2011_s22, 192  ;;  %p2825_p9 = scmp.lt.s32.totalorder %s2011_s22, %s2011_s22 }
 0x48d   :  { %1461 = vmatpush1.bf16.msra.mxu0 %v2563_v11  ;;  %v1228_v11 = vrot.slane %v1223_v9, %v3131_v63  ;;  %p2821_p8 = scmp.ne.s32.totalorder %s2011_s22, %s2820_s23  ;;  %p2826_p10 = scmp.lt.s32.totalorder %s2820_s23, %s2820_s23 }
 0x48e   :  { %1462 = vmatprep.subr.bf16.mxu0 %v2571_v16 }
 0x48f   :  { %p2827_p11 = por %p2826_p10, %p2825_p9 }
 0x491   :  { %1463 = vmatpush1.bf16.msra.mxu0 %v2569_v15  ;;  %v1240_v15 = vrot.slane %v1223_v9, %v3156_v31  ;;  %p2828_p12 = pnand %p2827_p11, %p2821_p8 }
 0x492   :  { %2251 = vmatprep.subr.bf16.mxu0 %v2573_v19 }
 0x508   :  { %v1157_v45 = vpop.xlane.xlu0 %1156 }
 0x509   :  { %v1160_v46 = vmul.f32 0.0078125, %v1157_v45  ;;  %v2579_v45 = vld [vmem:[#allocation11 + $0x88] sm:$0xff]  }
 0x50b   :  { %v3217_v36 = vsub.f32 %v1152_v33, %v1160_v46  ;;  %v2580_v46 = vld [vmem:[#allocation11 + $0x50] sm:$0xff]  }
 0x50c   :  { %v1154_v13 = vpop.xlane.xlu0 %1153 }
 0x50d   :  { %v1159_v47 = vmul.f32 0.0078125, %v1154_v13  ;;  %v1164_v50 = vmul.f32 %v3217_v36, %v3217_v36  ;;  %v2581_v13 = vld [vmem:[#allocation11 + $0xd0] sm:$0xff]  }
 0x50f   :  { %v3219_v48 = vsub.f32 %v1151_v37, %v1159_v47  ;;  %v1167_v51 = vsel %vm940_vm1, %v1164_v50, 0.0  ;;  %v1187_v37 = vrot.slane %v3232_v30, %v3131_v63  ;;  %v2582_v47 = vld [vmem:[#allocation11 + $0x10] sm:$0xff]   ;;  %v2586_v50 = vld [vmem:[#allocation11 + $0x18] sm:$0xff]  }
 0x511   :  { %v1163_v49 = vmul.f32 %v3219_v48, %v3219_v48 }
 0x513   :  { %1165 = vadd.xlane.f32.xlu1 %v1163_v49  ;;  %v2585_v49 = vld [vmem:[#allocation11 + $0xd8] sm:$0xff]  }
 0x517   :  { %1168 = vadd.xlane.f32.xlu1 %v1167_v51  ;;  %v2587_v51 = vld [vmem:[#allocation11 + $0x98] sm:$0xff]  }
 0x5a0   :  { %v1166_v20 = vpop.xlane.xlu1 %1165 }
 0x5a1   :  { %v1170_v21 = vmul.f32 0.0078125, %v1166_v20 }
 0x5a3   :  { %v1172_v22 = vadd.f32 1e-05, %v1170_v21 }
 0x5a4   :  { %v1169_v23 = vpop.xlane.xlu1 %1168 }
 0x5a5   :  { %2636 = vrsqrt.f32 %v1172_v22  ;;  %v1171_v24 = vmul.f32 0.0078125, %v1169_v23 }
 0x5a7   :  { %v1173_v25 = vadd.f32 1e-05, %v1171_v24 }
 0x5a9   :  { %2638 = vrsqrt.f32 %v1173_v25 }
 0x5af   :  { %v2637_v27 = vpop.eup %2636 }
 0x5b0   :  { %v1176_v29 = vmul.f32 %v2637_v27, %v3219_v48  ;;  %v2584_v48 = vld [vmem:[#allocation11 + $0x58] sm:$0xff]  }
 0x5b2   :  { %v1182_v34 = vmul.f32 %v1181_v28, %v1176_v29 }
 0x5b3   :  { %v2639_v33 = vpop.eup %2638 }
 0x5b4   :  { %v1177_v35 = vmul.f32 %v2639_v33, %v3217_v36  ;;  %v3237_v52 = vadd.f32 %v1187_v37, %v1182_v34  ;;  %v2583_v36 = vld [vmem:[#allocation11 + $0x90] sm:$0xff]  }
 0x5b6   :  { %v1183_v38 = vmul.f32 %v1181_v28, %v1177_v35 }
 0x5b8   :  { %v3239_v39 = vadd.f32 %v1187_v37, %v1183_v38 }
 0x5ba   :  { %v1190_v41 = vpack.c.bf16 %v3239_v39, %v3237_v52 }
 0x5bc   :  { %1438 = vmatmul.mubr.bf16.vlgmr.msra.gmra.mrb[20].mxu1 %v1190_v41  ;;  %1481 = vmatmul.mubr.bf16.vlgmr.msra.gmra.mrb[16].mxu0 %v1190_v41 }
 0x5bd   :  { %2230 = vmatpush3.bf16.msra.mxu1 %v2574_v59  ;;  %2252 = vmatpush3.bf16.msra.mxu0 %v2575_v40 }
 0x5be   :  { %2231 = vmatprep.subr.bf16.mxu1 %v2576_v43  ;;  %2253 = vmatprep.subr.bf16.mxu0 %v2577_v44 }
 0x5c1   :  { %2232 = vmatpush3.bf16.msra.mxu1 %v2578_v18  ;;  %2254 = vmatpush3.bf16.msra.mxu0 %v2579_v45 }
 0x5c2   :  { %2233 = vmatprep.subr.bf16.mxu1 %v2580_v46  ;;  %2255 = vmatprep.subr.bf16.mxu0 %v2581_v13 }
 0x5c5   :  { %2234 = vmatpush3.bf16.msra.mxu1 %v2582_v47  ;;  %2256 = vmatpush3.bf16.msra.mxu0 %v2583_v36 }
 0x5c6   :  { %2235 = vmatprep.subr.bf16.mxu1 %v2584_v48  ;;  %2257 = vmatprep.subr.bf16.mxu0 %v2585_v49  ;;  %v1570_v48 = vrot.slane %v3232_v30, %v3156_v31 }
 0x5c9   :  { %2236 = vmatpush3.bf16.msra.mxu1 %v2586_v50  ;;  %2258 = vmatpush3.bf16.msra.mxu0 %v2587_v51 }
 0x5ca   :  { %2237 = vmatprep.subr.bf16.mxu1 %v2588_v53  ;;  %2259 = vmatprep.subr.bf16.mxu0 %v2589_v54 }
 0x5cd   :  { %2238 = vmatpush3.bf16.msra.mxu1 %v2590_v55  ;;  %2260 = vmatpush3.bf16.msra.mxu0 %v2591_v56 }
 0x5ce   :  { %2239 = vmatprep.subr.bf16.mxu1 %v2592_v42  ;;  %2261 = vmatprep.subr.bf16.mxu0 %v2593_v58 }
 0x5d1   :  { %2240 = vmatpush3.bf16.msra.mxu1 %v2594_v60  ;;  %2262 = vmatpush3.bf16.msra.mxu0 %v2595_v61 }
 0x5d2   :  { %2241 = vmatprep.subr.bf16.mxu1 %v2596_v62  ;;  %2263 = vmatprep.subr.bf16.mxu0 %v2597_v1 }
 0x5d5   :  { %2242 = vmatpush3.bf16.msra.mxu1 %v2598_v2  ;;  %2264 = vmatpush3.bf16.msra.mxu0 %v2599_v3 }
 0x5d6   :  { %2243 = vmatprep.subr.bf16.mxu1 %v2600_v4  ;;  %2265 = vmatprep.subr.bf16.mxu0 %v2601_v5 }
 0x5d9   :  { %2244 = vmatpush3.bf16.msra.mxu1 %v2602_v6  ;;  %2266 = vmatpush3.bf16.msra.mxu0 %v2603_v7 }
 0x5da   :  { %2410 = vmatprep.subr.bf16.mxu1 %v2894_v0 }
 0x68f   :  { %v1439_v16 = vpop.f32.mrb[20].mxu1  ;;  %v1482_v17 = vpop.f32.mrb[16].mxu0 }
 0x690   :  { %v1440_v19 = vadd.f32 %v1439_v16, %v1228_v11  ;;  %v1483_v20 = vadd.f32 %v1482_v17, %v1236_v12  ;;  %v1441_v21 = vpop.f32.mrb[21].mxu1  ;;  %v1484_v22 = vpop.f32.mrb[17].mxu0  ;;  %v2604_v17 = vld [vmem:[#allocation13] sm:$0xff]  }
 0x691   :  { %v1442_v23 = vadd.f32 %v1441_v21, %v1232_v14  ;;  %v1485_v24 = vadd.f32 %v1484_v22, %v1240_v15  ;;  %v1443_v25 = vpop.f32.mrb[22].mxu1  ;;  %v1486_v26 = vpop.f32.mrb[18].mxu0  ;;  %v2609_v21 = vld [vmem:[#allocation13 + $0x28] sm:$0xff]   ;;  %v2610_v22 = vld [vmem:[#allocation13 + $0x30] sm:$0xff]  }
 0x692   :  { %v1444_v27 = vadd.f32 %v1443_v25, %v1228_v11  ;;  %v1487_v63 = vadd.f32 %v1486_v26, %v1236_v12  ;;  %v1445_v28 = vpop.f32.mrb[23].mxu1  ;;  %v1488_v29 = vpop.f32.mrb[19].mxu0  ;;  %v1491_v35 = vmax.f32 %v1440_v19, 0.0  ;;  %v1493_v37 = vmax.f32 %v1483_v20, 0.0  ;;  %v2607_v19 = vld [vmem:[#allocation13 + $0x18] sm:$0xff]   ;;  %v2608_v20 = vld [vmem:[#allocation13 + $0x20] sm:$0xff]  }
 0x693   :  { %v1446_v33 = vadd.f32 %v1445_v28, %v1232_v14  ;;  %v1489_v34 = vadd.f32 %v1488_v29, %v1240_v15  ;;  %v1492_v40 = vmax.f32 %v1442_v23, 0.0  ;;  %v1494_v41 = vmax.f32 %v1485_v24, 0.0  ;;  %v2611_v23 = vld [vmem:[#allocation13 + $0x38] sm:$0xff]  }
 0x694   :  { %v1495_v38 = vmax.f32 %v1444_v27, 0.0  ;;  %v1497_v59 = vmax.f32 %v1487_v63, 0.0  ;;  %v1874_v29 = vrot.slane %v3232_v30, %v1231_v10 }
 0x695   :  { %v1496_v43 = vmax.f32 %v1446_v33, 0.0  ;;  %v1498_v44 = vmax.f32 %v1489_v34, 0.0  ;;  %v1880_v34 = vrot.slane %v3232_v30, %v1235_v8 }
 0x696   :  { %v1499_v18 = vpack.c.bf16 %v1495_v38, %v1491_v35  ;;  %v1501_v45 = vpack.c.bf16 %v1497_v59, %v1493_v37 }
 0x697   :  { %v1500_v46 = vpack.c.bf16 %v1496_v43, %v1492_v40  ;;  %v1502_v13 = vpack.c.bf16 %v1498_v44, %v1494_v41 }
 0x699   :  { %1795 = vmatprep.mubr.bf16.mxu1 %v1500_v46  ;;  %1836 = vmatprep.mubr.bf16.mxu0 %v1502_v13 }
 0x69a   :  { %1796 = vmatmul.mubr.bf16.vlgmr.msra.gmra.mrb[24].mxu1 %v1499_v18  ;;  %1837 = vmatmul.mubr.bf16.vlgmr.msra.gmra.mrb[20].mxu0 %v1501_v45 }
 0x69b   :  { %2426 = vmatprep.mubr.msk.bf16.mxu1 %vm2895_vm0, %v2894_v0  ;;  %2411 = vmatpush3.bf16.msra.mxu1 %v2604_v17 }
 0x69c   :  { %2412 = vmatprep.subr.bf16.mxu1 %v2894_v0 }
 0x76d   :  { %v2245_v47 = vpop.f32.mrb[24].mxu1  ;;  %v2267_v36 = vpop.f32.mrb[20].mxu0 }
 0x76e   :  { %v2246_v49 = vpop.f32.mrb[25].mxu1  ;;  %v2268_v50 = vpop.f32.mrb[21].mxu0 }
 0x76f   :  { %v2247_v51 = vadd.f32 %v2246_v49, %v2245_v47  ;;  %v2269_v53 = vadd.f32 %v2268_v50, %v2267_v36  ;;  %v2248_v54 = vpop.f32.mrb[26].mxu1  ;;  %v2270_v55 = vpop.f32.mrb[22].mxu0 }
 0x770   :  { %v2249_v56 = vpop.f32.mrb[27].mxu1  ;;  %v2271_v42 = vpop.f32.mrb[23].mxu0 }
 0x771   :  { %v1798_v58 = vadd.f32 %v2247_v51, %v1570_v48  ;;  %v2250_v60 = vadd.f32 %v2249_v56, %v2248_v54  ;;  %v2272_v61 = vadd.f32 %v2271_v42, %v2270_v55 }
 0x773   :  { %v1839_v62 = vadd.f32 %v2269_v53, %v1798_v58  ;;  %v1801_v1 = vadd.f32 %v2250_v60, %v1570_v48 }
 0x775   :  { %v1842_v2 = vadd.f32 %v2272_v61, %v1801_v1  ;;  %v1845_v3 = vadd.f32 %v1839_v62, %v3237_v52  ;;  %v2605_v52 = vld [vmem:[#allocation13 + $0x8] sm:$0xff]  }
 0x776   :  { %2413 = vmatpush3.bf16.msra.mxu1 %v2605_v52 }
 0x777   :  { %1847 = vadd.xlane.f32.xlu0 %v1845_v3  ;;  %v1846_v4 = vadd.f32 %v1842_v2, %v3239_v39  ;;  %2414 = vmatprep.subr.bf16.mxu1 %v2894_v0  ;;  %v2606_v39 = vld [vmem:[#allocation13 + $0x10] sm:$0xff]  }
 0x779   :  { %v1849_v31 = vsel %vm940_vm1, %v1846_v4, 0.0 }
 0x77a   :  { %1850 = vadd.xlane.f32.xlu1 %v1849_v31  ;;  %2415 = vmatpush3.bf16.msra.mxu1 %v2606_v39 }
 0x77b   :  { %2416 = vmatprep.subr.bf16.mxu1 %v2894_v0 }
 0x77e   :  { %2417 = vmatpush3.bf16.msra.mxu1 %v2607_v19 }
 0x77f   :  { %2418 = vmatprep.subr.bf16.mxu1 %v2894_v0 }
 0x782   :  { %2419 = vmatpush3.bf16.msra.mxu1 %v2608_v20 }
 0x783   :  { %2420 = vmatprep.subr.bf16.mxu1 %v2894_v0 }
 0x786   :  { %2421 = vmatpush3.bf16.msra.mxu1 %v2609_v21 }
 0x787   :  { %2422 = vmatprep.subr.bf16.mxu1 %v2894_v0 }
 0x78a   :  { %2423 = vmatpush3.bf16.msra.mxu1 %v2610_v22 }
 0x78b   :  { %2424 = vmatprep.subr.bf16.mxu1 %v2894_v0 }
 0x78e   :  { %2425 = vmatpush3.bf16.msra.mxu1 %v2611_v23 }
 0x804   :  { %v1848_v5 = vpop.xlane.xlu0 %1847 }
 0x805   :  { %v1852_v6 = vmul.f32 0.0078125, %v1848_v5 }
 0x807   :  { %v1854_v7 = vsub.f32 %v1845_v3, %v1852_v6  ;;  %v1851_v9 = vpop.xlane.xlu1 %1850 }
 0x808   :  { %v1853_v11 = vmul.f32 0.0078125, %v1851_v9 }
 0x809   :  { %v1856_v12 = vmul.f32 %v1854_v7, %v1854_v7 }
 0x80a   :  { %v1855_v14 = vsub.f32 %v1846_v4, %v1853_v11 }
 0x80b   :  { %1858 = vadd.xlane.f32.xlu0 %v1856_v12 }
 0x80c   :  { %v1857_v15 = vmul.f32 %v1855_v14, %v1855_v14 }
 0x80e   :  { %v1860_v16 = vsel %vm940_vm1, %v1857_v15, 0.0 }
 0x80f   :  { %1861 = vadd.xlane.f32.xlu1 %v1860_v16 }
 0x898   :  { %v1859_v24 = vpop.xlane.xlu0 %1858 }
 0x899   :  { %v1863_v25 = vmul.f32 0.0078125, %v1859_v24 }
 0x89b   :  { %v1865_v26 = vadd.f32 1e-05, %v1863_v25 }
 0x89c   :  { %v1862_v27 = vpop.xlane.xlu1 %1861 }
 0x89d   :  { %2640 = vrsqrt.f32 %v1865_v26  ;;  %v1864_v63 = vmul.f32 0.0078125, %v1862_v27 }
 0x89f   :  { %v1866_v28 = vadd.f32 1e-05, %v1864_v63 }
 0x8a1   :  { %2642 = vrsqrt.f32 %v1866_v28 }
 0x8a7   :  { %v2641_v33 = vpop.eup %2640 }
 0x8a8   :  { %v1869_v35 = vmul.f32 %v2641_v33, %v1854_v7 }
 0x8aa   :  { %v1875_v0 = vmul.f32 %v1874_v29, %v1869_v35 }
 0x8ab   :  { %v2643_v37 = vpop.eup %2642 }
 0x8ac   :  { %v1870_v38 = vmul.f32 %v2643_v37, %v1855_v14  ;;  %v1881_v59 = vadd.f32 %v1880_v34, %v1875_v0 }
 0x8ae   :  { %v1876_v40 = vmul.f32 %v1874_v29, %v1870_v38  ;;  %v1884_v41 = vcombine.high %v1881_v59, %v1881_v59  ;;  %v1886_v44 = vsel %vm940_vm1, %v1881_v59, 0.0 }
 0x8b0   :  { %v1882_v43 = vadd.f32 %v1880_v34, %v1876_v40  ;;  %v1887_v18 = vsel %vm940_vm1, %v1884_v41, 0.0 }
 0x8b1   :  { %v1888_v45 = vadd.f32 %v1887_v18, %v1886_v44 }
 0x8b2   :  { %v1889_v10 = vsel %vm940_vm1, %v1882_v43, 0.0 }
 0x8b3   :  { %v1890_v46 = vadd.f32 %v1889_v10, %v1888_v45 }
 0x8b5   :  { %v1892_v13 = vmul.f32 0.33333334, %v1890_v46 }
 0x8b7   :  { %v1893_v47 = vpack.c.bf16 %v1892_v13, %v1892_v13 }
 0x8b9   :  { %2427 = vmatmul.mubr.bf16.vlgmr.msra.gmra.mrb[28].mxu1 %v1893_v47 }
 0x8ba   :  { %2831 = shalt.err (!%p2828_p12)
}
 0x8bb   :  { %s2832_s1 = scalar_lea.hbm %s3316_s10, 192 }
 0x8bc   :  { %p2833_p13 = scmp.ne.s32.totalorder %s3316_s10, %s2832_s1  ;;  %p2836_p0 = scmp.lt.u32.totalorder %s2832_s1, %s3316_s10 }
 0x8be   :  { %p2838_p1 = pnand %p2836_p0, %p2833_p13 }
 0x8c0   :  { %2841 = shalt.err (!%p2838_p1)
}
 0x8c1   :  { %2013 = dma.vmem_to_hbm [thread:$0]  %s2011_s22, 192, %s3316_s10, [#allocation4]   ;;  %v1913_v8 = vrot.slane %v3232_v30, %v764_v32 }
 0x8c2   :  { %s2899_s15 = smov [#allocation17]  }
 0x8c3   :  { %s2020_s29 = sshll.u32 %s2899_s15, 4  ;;  %s2021_s29 = int_to_ptr.vmem [resolvable:$true] %s2020_s29 }
 0x8c4   :  { %s2842_s30 = scalar_lea.vmem %s2021_s29, 64  ;;  %p2847_p3 = scmp.lt.s32.totalorder %s2021_s29, %s2021_s29 }
 0x8c5   :  { %p2843_p2 = scmp.ne.s32.totalorder %s2021_s29, %s2842_s30  ;;  %p2848_p4 = scmp.lt.s32.totalorder %s2842_s30, %s2842_s30 }
 0x8c7   :  { %p2849_p5 = por %p2848_p4, %p2847_p3 }
 0x8c9   :  { %p2850_p6 = pnand %p2849_p5, %p2843_p2 }
 0x98c   :  { %v1996_v36 = vpop.f32.mrb[28].mxu1 }
 0x98d   :  { %v1997_v48 = vadd.f32 %v1996_v36, %v1913_v8  ;;  %v2428_v49 = vpop.f32.mrb[29].mxu1 }
 0x98e   :  { %v1999_v50 = vpop.f32.mrb[30].mxu1 }
 0x98f   :  { %v2002_v51 = vmax.f32 %v1997_v48, 0.0  ;;  %v2429_v53 = vpop.f32.mrb[31].mxu1 }
 0x991   :  { %2003 = vst [vmem:[#allocation17] sm:$0xf] %v2002_v51 }
 0x992   :  { %2853 = shalt.err (!%p2850_p6)
}
 0x993   :  { %s2854_s16 = scalar_lea.hbm %s3317_s11, 64 }
 0x994   :  { %p2855_p7 = scmp.ne.s32.totalorder %s3317_s11, %s2854_s16  ;;  %p2858_p8 = scmp.lt.u32.totalorder %s2854_s16, %s3317_s11 }
 0x996   :  { %p2860_p9 = pnand %p2858_p8, %p2855_p7 }
 0x998   :  { %2863 = shalt.err (!%p2860_p9)
}
 0x999   :  { %2023 = dma.vmem_to_hbm [thread:$0]  %s2021_s29, 64, %s3317_s11, [#allocation18]  }
 0x99a   :  { %2874 = dma.done.wait [#allocation4], 192  }
 0x99b   :  { %2875 = vsyncadd [#allocation4], 4294967104 }
 0x99c   :  { %2876 = dma.done.wait [#allocation18], 64  }
 0x99d   :  { %2877 = vsyncadd [#allocation18], 4294967232 }
 0x99e   :  { %2030 = vsyncpa [#allocation3], 1 }
 0x99f   :  { %2031 = vsyncpa [#allocation6], 1 }
 0x9a0   :  { %2032 = vsyncpa [#allocation9], 1 }
 0x9a1   :  { %2033 = vsyncpa [#allocation12], 1 }
 0x9a2   :  { %2034 = vsyncpa [#allocation15], 1 }
 0x9a3   :  { %2035 = vsyncpa [#allocation4], 1 }
 0x9a4   :  { %2036 = vsyncpa [#allocation18], 1 }

</bundles_post_ra>
